<compile_context>
chip_gen: v6e
topology: v6e:2x2x1
jax: 0.10.0
libtpu: 0.0.40
codegen_flags: <defaults>
</compile_context>

<pallas_src>
import jax
import jax.numpy as jnp
import numpy as np
from jax.experimental import pallas as pl
from jax.experimental.pallas import tpu as pltpu

K = 15            # conv kernel size
PAD = 7           # conv padding
L_IN = 44         # input length: 44 -> pool -> 22 -> pool -> 11, 32*11 = 352 = fc1 in
C1, C2 = 16, 32   # conv channel counts
L1, L2 = L_IN, L_IN // 2          # conv output lengths (44, 22)
LP1, LP2 = L_IN // 2, L_IN // 4   # pooled lengths (22, 11)
H1 = 64           # fc1 output features
LPAD = L_IN + 2 * PAD             # 58: zero-padded input length

HALF1 = LP1 * C1                  # 352 valid lanes per pooling half after conv1
HALF2 = LP2 * C2                  # 352 valid lanes per pooling half after conv2
NH = 384                          # half-slab width (3*128, lane aligned)
N1 = 2 * NH                       # 768 conv1 output lanes (even half | odd half)
N2 = 2 * NH                       # 768 conv2 output lanes

MAX_TB = 1024                     # batch-tile cap


def cnn_kernel(x_ref, w1_ref, b1_ref, w2_ref, b2_ref, f1_ref, fb1_ref,
               fw2_ref, fb2_ref, out_ref):
    # ---- conv1 as one banded bf16 matmul: (TB,58) @ (58,768), f32 accumulate ----
    # columns: even pool positions in lanes [0,384), odd in [384,768)
    x = x_ref[...].astype(jnp.bfloat16)
    a1 = jnp.dot(x, w1_ref[...], preferred_element_type=jnp.float32)
    a1 = jnp.maximum(a1 + b1_ref[...], 0.0)                      # (TB, 768) f32

    # ---- maxpool1: one full-vreg max of two 128-lane-aligned half-slabs ----
    m1 = jnp.maximum(a1[:, :NH], a1[:, NH:])                     # (TB, 384)

    # ---- conv2 as one banded bf16 matmul (zero-padding folded into the band) ----
    a2 = jnp.dot(m1.astype(jnp.bfloat16), w2_ref[...],
                 preferred_element_type=jnp.float32)
    a2 = jnp.maximum(a2 + b2_ref[...], 0.0)                      # (TB, 768) f32

    # ---- maxpool2: aligned half-slab max ----
    m2 = jnp.maximum(a2[:, :NH], a2[:, NH:])                     # (TB, 384)

    # ---- fc1 (32 zero pad rows only) + ReLU ----
    z1 = jnp.dot(m2.astype(jnp.bfloat16), f1_ref[...],
                 preferred_element_type=jnp.float32)
    z1 = jnp.maximum(z1 + fb1_ref[...], 0.0)                     # (TB, 64)

    # ---- fc2 on the VPU/XLU: multiply + lane reduce; lane-dense (1,1,TB) store ----
    z2 = jnp.sum(z1 * fw2_ref[...], axis=-1)                     # (TB,)
    out_ref[...] = z2[None, None, :] + fb2_ref[...].reshape(1, 1, 1)


def build_banded_params(params):
    """Build banded (Toeplitz-style) weights once per parameter set.

    Output columns of both conv bands are deinterleaved by pool parity:
    even pool positions -> lanes [0,352) (padded to 384), odd -> [384,736)
    (padded to 768), so each max-pool is a single aligned half-slab max.
    Matmul weights are bf16 (native MXU dtype); biases stay f32.
    """
    w1, b1, w2, b2, fw1, fb1, fw2, fb2 = params
    f32, bf16 = jnp.float32, jnp.bfloat16

    # conv1 band: (58, 768); column j -> half = j//384 (pool parity), jj = j%384,
    # pool group g = jj//16, channel c = jj%16, conv output position l = 2g+half.
    p = jnp.arange(LPAD)[:, None]                                 # (58, 1)
    j1 = jnp.arange(N1)[None, :]                                  # (1, 768)
    half1 = j1 // NH
    jj1 = j1 % NH
    g1, c1 = jj1 // C1, jj1 % C1
    col_ok1 = g1 < LP1                                            # lanes 352..383 of each half pad
    l1 = 2 * g1 + half1
    k1 = p - l1
    w1sq = w1[:, 0, :].astype(f32)                                # (C1, K)
    W1b = jnp.where(col_ok1 & (k1 >= 0) & (k1 < K),
                    w1sq[c1, jnp.clip(k1, 0, K - 1)], 0.0).astype(bf16)
    b1b = jnp.where(col_ok1, b1.astype(f32)[c1], 0.0).reshape(1, N1)

    # conv2 band: (384, 768); row r -> pooled position pin = r//16, channel ci = r%16
    # (valid iff r < 352); column j -> (parity, pool group g2, channel co) as above;
    # value w2[co, ci, pin - l2 + PAD] with l2 = 2*g2 + parity.
    r2 = jnp.arange(NH)[:, None]                                  # (384, 1)
    pin, ci = r2 // C1, r2 % C1
    row_ok2 = r2 < HALF1
    j2 = jnp.arange(N2)[None, :]                                  # (1, 768)
    half2 = j2 // NH
    jj2 = j2 % NH
    g2, co2 = jj2 // C2, jj2 % C2
    col_ok2 = g2 < LP2
    l2 = 2 * g2 + half2
    k2 = pin - l2 + PAD
    W2b = jnp.where(row_ok2 & col_ok2 & (k2 >= 0) & (k2 < K),
                    w2.astype(f32)[co2, ci, jnp.clip(k2, 0, K - 1)], 0.0).astype(bf16)
    b2b = jnp.where(col_ok2, b2.astype(f32)[co2], 0.0).reshape(1, N2)

    # fc1 band: (384, 64); row r -> pool2 position g3 = r//32, channel co = r%32
    # (valid iff r < 352) -> fw1[:, co*11 + g3] (PyTorch flatten order c*11 + l).
    r3 = jnp.arange(NH)[:, None]                                  # (384, 1)
    g3, co3 = r3 // C2, r3 % C2
    row_ok3 = r3 < HALF2
    h = jnp.arange(H1)[None, :]                                   # (1, 64)
    flat_idx = jnp.clip(co3 * LP2 + g3, 0, C2 * LP2 - 1)
    F1b = jnp.where(row_ok3, fw1.astype(f32)[h, flat_idx], 0.0).astype(bf16)

    fb1r = fb1.reshape(1, H1).astype(f32)
    fw2r = fw2.reshape(1, H1).astype(f32)
    fb2r = fb2.reshape(1, 1).astype(f32)
    return (W1b, b1b, W2b, b2b, F1b, fb1r, fw2r, fb2r)


def _round_up(x, m):
    return ((x + m - 1) // m) * m


def cnn_regressor_forward(x_ncl, banded, *, tb=None):
    """x_ncl: (B, 1, L_IN) float32 in PyTorch NCL layout. `banded` from
    build_banded_params (built once per parameter set). Returns (B,)."""
    B = x_ncl.shape[0]
    if tb is None:
        # Adaptive batch tile: cap at 1024, multiple of 128, and (when the batch
        # allows) sized so the grid has >= 2 steps for the two v7x TensorCores.
        tb = min(MAX_TB, max(128, _round_up((B + 1) // 2, 128)))

    # glue: (B,1,44) -> (B,44) -> zero-pad length to 58 -> pad batch to tile multiple
    x2d = x_ncl[:, 0, :].astype(jnp.float32)
    xpad = jnp.pad(x2d, ((0, 0), (PAD, PAD)))                     # (B, 58)
    G = pl.cdiv(B, tb)
    Bp = G * tb
    xpad = jnp.pad(xpad, ((0, Bp - B), (0, 0)))                   # (Bp, 58)

    def resident(a):
        nd = a.ndim
        return pl.BlockSpec(a.shape, lambda i, _nd=nd: (0,) * _nd)

    out = pl.pallas_call(
        cnn_kernel,
        out_shape=jax.ShapeDtypeStruct((G, 1, tb), jnp.float32),
        grid_spec=pltpu.PrefetchScalarGridSpec(
            num_scalar_prefetch=0,
            grid=(G,),
            in_specs=[pl.BlockSpec((tb, LPAD), lambda i: (i, 0))]
                     + [resident(w) for w in banded],
            out_specs=pl.BlockSpec((1, 1, tb), lambda i: (i, 0, 0)),
        ),
        compiler_params=pltpu.CompilerParams(
            dimension_semantics=("parallel",),
            vmem_limit_bytes=32 * 1024 * 1024,
        ),
    )(xpad, *banded)
    return out.reshape(Bp)[:B]


def init_params(key):
    """Deterministic synthetic init (PyTorch-default-like uniform bounds)."""
    ks = jax.random.split(key, 8)

    def u(k, shape, fan_in):
        bound = 1.0 / np.sqrt(fan_in)
        return jax.random.uniform(k, shape, jnp.float32, -bound, bound)

    w1 = u(ks[0], (C1, 1, K), 1 * K)          # Conv1d(1, 16, 15)
    b1 = u(ks[1], (C1,), 1 * K)
    w2 = u(ks[2], (C2, C1, K), C1 * K)        # Conv1d(16, 32, 15)
    b2 = u(ks[3], (C2,), C1 * K)
    fw1 = u(ks[4], (H1, C2 * LP2), C2 * LP2)  # Linear(352, 64)
    fb1 = u(ks[5], (H1,), C2 * LP2)
    fw2 = u(ks[6], (1, H1), H1)               # Linear(64, 1)
    fb2 = u(ks[7], (1,), H1)
    return (w1, b1, w2, b2, fw1, fb1, fw2, fb2)


def ref_forward(x_ncl, params):
    """Pure-JAX reference matching the PyTorch forward exactly (NCL layout)."""
    w1, b1, w2, b2, fw1, fb1, fw2, fb2 = params
    dn = ('NCH', 'OIH', 'NCH')
    y = jax.lax.conv_general_dilated(x_ncl, w1, (1,), [(PAD, PAD)], dimension_numbers=dn)
    y = jnp.maximum(y + b1[None, :, None], 0.0)
    y = jnp.max(y.reshape(y.shape[0], C1, LP1, 2), axis=3)
    y = jax.lax.conv_general_dilated(y, w2, (1,), [(PAD, PAD)], dimension_numbers=dn)
    y = jnp.maximum(y + b2[None, :, None], 0.0)
    y = jnp.max(y.reshape(y.shape[0], C2, LP2, 2), axis=3)
    flat = y.reshape(y.shape[0], C2 * LP2)
    z1 = jnp.maximum(flat @ fw1.T + fb1, 0.0)
    z2 = z1 @ fw2.T + fb2
    return z2[:, 0]


if __name__ == "__main__":
    key = jax.random.PRNGKey(0)
    kx, kp = jax.random.split(key)
    B = 2
    x = jax.random.normal(kx, (B, 1, L_IN), jnp.float32)   # PyTorch NCL input
    params = init_params(kp)

    # Banded bf16 weights built ONCE per parameter set (hoisted out of forward).
    banded = build_banded_params(params)
    banded = jax.tree_util.tree_map(jax.block_until_ready, banded)

    fwd = jax.jit(cnn_regressor_forward)
    out = fwd(x, banded)
    out = jax.block_until_ready(out)

    ref = ref_forward(x, params)
    # bf16 matmul operands with f32 accumulation: slightly looser tolerance.
    np.testing.assert_allclose(np.asarray(out), np.asarray(ref), rtol=2e-2, atol=2e-2)
    print("KERNEL_OK")
</pallas_src>

<mosaic_0001>
module attributes {stable_mosaic.version = 11 : i64} {
  func.func @cnn_kernel(%arg0: i32, %arg1: memref<128x58xf32, #tpu.memory_space<vmem>>, %arg2: memref<58x768xbf16, #tpu.memory_space<vmem>>, %arg3: memref<1x768xf32, #tpu.memory_space<vmem>>, %arg4: memref<384x768xbf16, #tpu.memory_space<vmem>>, %arg5: memref<1x768xf32, #tpu.memory_space<vmem>>, %arg6: memref<384x64xbf16, #tpu.memory_space<vmem>>, %arg7: memref<1x64xf32, #tpu.memory_space<vmem>>, %arg8: memref<1x64xf32, #tpu.memory_space<vmem>>, %arg9: memref<1x1xf32, #tpu.memory_space<vmem>>, %arg10: memref<1x1x128xf32, #tpu.memory_space<vmem>>) attributes {dimension_semantics = [#tpu.dimension_semantics<parallel>], iteration_bounds = array<i64: 1>, scalar_prefetch = 0 : i64, scratch_operands = 0 : i64, tpu.core_type = #tpu.core_type<tc>, window_params = [{transform_indices = @transform_0, window_bounds = array<i64: 128, 58>}, {pipeline_mode = #tpu.pipeline_mode<synchronous>, transform_indices = @transform_1, window_bounds = array<i64: 58, 768>}, {pipeline_mode = #tpu.pipeline_mode<synchronous>, transform_indices = @transform_2, window_bounds = array<i64: 1, 768>}, {pipeline_mode = #tpu.pipeline_mode<synchronous>, transform_indices = @transform_3, window_bounds = array<i64: 384, 768>}, {pipeline_mode = #tpu.pipeline_mode<synchronous>, transform_indices = @transform_4, window_bounds = array<i64: 1, 768>}, {pipeline_mode = #tpu.pipeline_mode<synchronous>, transform_indices = @transform_5, window_bounds = array<i64: 384, 64>}, {pipeline_mode = #tpu.pipeline_mode<synchronous>, transform_indices = @transform_6, window_bounds = array<i64: 1, 64>}, {pipeline_mode = #tpu.pipeline_mode<synchronous>, transform_indices = @transform_7, window_bounds = array<i64: 1, 64>}, {pipeline_mode = #tpu.pipeline_mode<synchronous>, transform_indices = @transform_8, window_bounds = array<i64: 1, 1>}, {transform_indices = @transform_9, window_bounds = array<i64: 1, 1, 128>}]} {
    %c0 = arith.constant 0 : index
    %c0_0 = arith.constant 0 : index
    %0 = vector.load %arg1[%c0, %c0_0] : memref<128x58xf32, #tpu.memory_space<vmem>>, vector<128x58xf32>
    %1 = arith.truncf %0 : vector<128x58xf32> to vector<128x58xbf16>
    %c0_1 = arith.constant 0 : index
    %c0_2 = arith.constant 0 : index
    %2 = vector.load %arg2[%c0_1, %c0_2] : memref<58x768xbf16, #tpu.memory_space<vmem>>, vector<58x768xbf16>
    %cst = arith.constant dense<0.000000e+00> : vector<128x768xf32>
    %3 = tpu.matmul %1, %2, %cst {dimension_numbers = #tpu.dot_dimension_numbers<[1], [0], [0], [1], [0, 0, 1, 1], [], []>} : vector<128x58xbf16>, vector<58x768xbf16>, vector<128x768xf32> -> vector<128x768xf32>
    %c0_3 = arith.constant 0 : index
    %c0_4 = arith.constant 0 : index
    %4 = vector.load %arg3[%c0_3, %c0_4] : memref<1x768xf32, #tpu.memory_space<vmem>>, vector<1x768xf32>
    %5 = vector.broadcast %4 : vector<1x768xf32> to vector<128x768xf32>
    %6 = arith.addf %3, %5 : vector<128x768xf32>
    %cst_5 = arith.constant 0.000000e+00 : f32
    %7 = vector.broadcast %cst_5 : f32 to vector<128x768xf32>
    %8 = arith.maximumf %6, %7 : vector<128x768xf32>
    %9 = vector.extract_strided_slice %8 {offsets = [0, 0], sizes = [128, 384], strides = [1, 1]} : vector<128x768xf32> to vector<128x384xf32>
    %10 = vector.extract_strided_slice %8 {offsets = [0, 384], sizes = [128, 384], strides = [1, 1]} : vector<128x768xf32> to vector<128x384xf32>
    %11 = arith.maximumf %9, %10 : vector<128x384xf32>
    %12 = arith.truncf %11 : vector<128x384xf32> to vector<128x384xbf16>
    %c0_6 = arith.constant 0 : index
    %c0_7 = arith.constant 0 : index
    %13 = vector.load %arg4[%c0_6, %c0_7] : memref<384x768xbf16, #tpu.memory_space<vmem>>, vector<384x768xbf16>
    %cst_8 = arith.constant dense<0.000000e+00> : vector<128x768xf32>
    %14 = tpu.matmul %12, %13, %cst_8 {dimension_numbers = #tpu.dot_dimension_numbers<[1], [0], [0], [1], [0, 0, 1, 1], [], []>} : vector<128x384xbf16>, vector<384x768xbf16>, vector<128x768xf32> -> vector<128x768xf32>
    %c0_9 = arith.constant 0 : index
    %c0_10 = arith.constant 0 : index
    %15 = vector.load %arg5[%c0_9, %c0_10] : memref<1x768xf32, #tpu.memory_space<vmem>>, vector<1x768xf32>
    %16 = vector.broadcast %15 : vector<1x768xf32> to vector<128x768xf32>
    %17 = arith.addf %14, %16 : vector<128x768xf32>
    %cst_11 = arith.constant 0.000000e+00 : f32
    %18 = vector.broadcast %cst_11 : f32 to vector<128x768xf32>
    %19 = arith.maximumf %17, %18 : vector<128x768xf32>
    %20 = vector.extract_strided_slice %19 {offsets = [0, 0], sizes = [128, 384], strides = [1, 1]} : vector<128x768xf32> to vector<128x384xf32>
    %21 = vector.extract_strided_slice %19 {offsets = [0, 384], sizes = [128, 384], strides = [1, 1]} : vector<128x768xf32> to vector<128x384xf32>
    %22 = arith.maximumf %20, %21 : vector<128x384xf32>
    %23 = arith.truncf %22 : vector<128x384xf32> to vector<128x384xbf16>
    %c0_12 = arith.constant 0 : index
    %c0_13 = arith.constant 0 : index
    %24 = vector.load %arg6[%c0_12, %c0_13] : memref<384x64xbf16, #tpu.memory_space<vmem>>, vector<384x64xbf16>
    %cst_14 = arith.constant dense<0.000000e+00> : vector<128x64xf32>
    %25 = tpu.matmul %23, %24, %cst_14 {dimension_numbers = #tpu.dot_dimension_numbers<[1], [0], [0], [1], [0, 0, 1, 1], [], []>} : vector<128x384xbf16>, vector<384x64xbf16>, vector<128x64xf32> -> vector<128x64xf32>
    %c0_15 = arith.constant 0 : index
    %c0_16 = arith.constant 0 : index
    %26 = vector.load %arg7[%c0_15, %c0_16] : memref<1x64xf32, #tpu.memory_space<vmem>>, vector<1x64xf32>
    %27 = vector.broadcast %26 : vector<1x64xf32> to vector<128x64xf32>
    %28 = arith.addf %25, %27 : vector<128x64xf32>
    %cst_17 = arith.constant 0.000000e+00 : f32
    %29 = vector.broadcast %cst_17 : f32 to vector<128x64xf32>
    %30 = arith.maximumf %28, %29 : vector<128x64xf32>
    %c0_18 = arith.constant 0 : index
    %c0_19 = arith.constant 0 : index
    %31 = vector.load %arg8[%c0_18, %c0_19] : memref<1x64xf32, #tpu.memory_space<vmem>>, vector<1x64xf32>
    %32 = vector.broadcast %31 : vector<1x64xf32> to vector<128x64xf32>
    %33 = arith.mulf %30, %32 : vector<128x64xf32>
    %cst_20 = arith.constant dense<0.000000e+00> : vector<128xf32>
    %34 = vector.multi_reduction <add>, %33, %cst_20 [1] : vector<128x64xf32> to vector<128xf32>
    %35 = vector.shape_cast %34 : vector<128xf32> to vector<1x1x128xf32>
    %c0_21 = arith.constant 0 : index
    %c0_22 = arith.constant 0 : index
    %36 = vector.load %arg9[%c0_21, %c0_22] : memref<1x1xf32, #tpu.memory_space<vmem>>, vector<1x1xf32>
    %37 = vector.shape_cast %36 : vector<1x1xf32> to vector<1x1x1xf32>
    %38 = vector.broadcast %37 : vector<1x1x1xf32> to vector<1x1x128xf32>
    %39 = arith.addf %35, %38 : vector<1x1x128xf32>
    %c0_23 = arith.constant 0 : index
    %c0_24 = arith.constant 0 : index
    %c0_25 = arith.constant 0 : index
    %40 = vector.load %arg10[%c0_23, %c0_24, %c0_25] : memref<1x1x128xf32, #tpu.memory_space<vmem>>, vector<1x1x128xf32>
    tpu.vector_store %arg10[%c0_23, %c0_24, %c0_25], %39 {strides = array<i32>} : memref<1x1x128xf32, #tpu.memory_space<vmem>>, vector<1x1x128xf32>,
    return
  }
  func.func @transform_0(%arg0: i32) -> (i32, i32) {
    %c0_i32 = arith.constant 0 : i32
    %c0_i32_0 = arith.constant 0 : i32
    return %arg0, %c0_i32 : i32, i32
  }
  func.func @transform_1(%arg0: i32) -> (i32, i32) {
    %c0_i32 = arith.constant 0 : i32
    %c0_i32_0 = arith.constant 0 : i32
    %c0_i32_1 = arith.constant 0 : i32
    return %c0_i32, %c0_i32_0 : i32, i32
  }
  func.func @transform_2(%arg0: i32) -> (i32, i32) {
    %c0_i32 = arith.constant 0 : i32
    %c0_i32_0 = arith.constant 0 : i32
    %c0_i32_1 = arith.constant 0 : i32
    return %c0_i32, %c0_i32_0 : i32, i32
  }
  func.func @transform_3(%arg0: i32) -> (i32, i32) {
    %c0_i32 = arith.constant 0 : i32
    %c0_i32_0 = arith.constant 0 : i32
    %c0_i32_1 = arith.constant 0 : i32
    return %c0_i32, %c0_i32_0 : i32, i32
  }
  func.func @transform_4(%arg0: i32) -> (i32, i32) {
    %c0_i32 = arith.constant 0 : i32
    %c0_i32_0 = arith.constant 0 : i32
    %c0_i32_1 = arith.constant 0 : i32
    return %c0_i32, %c0_i32_0 : i32, i32
  }
  func.func @transform_5(%arg0: i32) -> (i32, i32) {
    %c0_i32 = arith.constant 0 : i32
    %c0_i32_0 = arith.constant 0 : i32
    %c0_i32_1 = arith.constant 0 : i32
    return %c0_i32, %c0_i32_0 : i32, i32
  }
  func.func @transform_6(%arg0: i32) -> (i32, i32) {
    %c0_i32 = arith.constant 0 : i32
    %c0_i32_0 = arith.constant 0 : i32
    %c0_i32_1 = arith.constant 0 : i32
    return %c0_i32, %c0_i32_0 : i32, i32
  }
  func.func @transform_7(%arg0: i32) -> (i32, i32) {
    %c0_i32 = arith.constant 0 : i32
    %c0_i32_0 = arith.constant 0 : i32
    %c0_i32_1 = arith.constant 0 : i32
    return %c0_i32, %c0_i32_0 : i32, i32
  }
  func.func @transform_8(%arg0: i32) -> (i32, i32) {
    %c0_i32 = arith.constant 0 : i32
    %c0_i32_0 = arith.constant 0 : i32
    %c0_i32_1 = arith.constant 0 : i32
    return %c0_i32, %c0_i32_0 : i32, i32
  }
  func.func @transform_9(%arg0: i32) -> (i32, i32, i32) {
    %c0_i32 = arith.constant 0 : i32
    %c0_i32_0 = arith.constant 0 : i32
    %c0_i32_1 = arith.constant 0 : i32
    return %arg0, %c0_i32, %c0_i32_0 : i32, i32, i32
  }
}

</mosaic_0001>

<bundles_post_ra>
// kernel: cnn_regressor_forward.1
= control target key start
LH: loop header
LB: loop body
LE: loop exit
PB: predicated region body
PF: predicated region fallthrough
CT: control target
= control target key end

     0   :  { %s5181_s0 = inlined_call_operand.vmem [shape: f32[128,58], index: 0, kind: input, shape index: {}]   ;;  %s5182_s1 = inlined_call_operand.vmem [shape: bf16[58,768], index: 1, kind: input, shape index: {}]   ;;  %s5183_s2 = inlined_call_operand.vmem [shape: f32[1,768], index: 2, kind: input, shape index: {}]   ;;  %s5184_s3 = inlined_call_operand.hbm [shape: bf16[384,768], index: 3, kind: input, shape index: {}]   ;;  %s5185_s4 = inlined_call_operand.vmem [shape: f32[1,768], index: 4, kind: input, shape index: {}]   ;;  %s5186_s5 = inlined_call_operand.vmem [shape: bf16[384,64], index: 5, kind: input, shape index: {}]   ;;  %s5187_s6 = inlined_call_operand.vmem [shape: f32[1,64], index: 6, kind: input, shape index: {}]   ;;  %s5188_s7 = inlined_call_operand.vmem [shape: f32[1,64], index: 7, kind: input, shape index: {}]   ;;  %s5189_s8 = inlined_call_operand.<no memory space> [shape: f32[1,1], index: 8, kind: input, shape index: {}]   ;;  %s5190_s9 = inlined_call_operand.vmem [shape: f32[1,1,128], index: 9, kind: output, shape index: {}]  }
   0x1   :  { %v14_v0 = vstv %s5189_s8 }
   0x2   :  { %15 = vst [vmem:[#allocation2] sm:$0x1] %v14_v0 }
   0x3   :  { %16 = vsyncpa [#allocation4], 0  ;;  %s3822_s11 = smov [#allocation3]  }
   0x4   :  { %s28_s12 = sshll.u32 %s3822_s11, 4  ;;  %s29_s12 = int_to_ptr.vmem [resolvable:$true] %s28_s12 }
   0x5   :  { %s3808_s13 = scalar_lea.vmem %s29_s12, 18432  ;;  %p3813_p1 = scmp.lt.s32.totalorder %s29_s12, %s29_s12 }
   0x6   :  { %p3809_p0 = scmp.ne.s32.totalorder %s29_s12, %s3808_s13  ;;  %p3814_p2 = scmp.lt.s32.totalorder %s3808_s13, %s3808_s13 }
   0x8   :  { %p3815_p3 = por %p3814_p2, %p3813_p1 }
   0xa   :  { %p3816_p4 = pnand %p3815_p3, %p3809_p0 }
   0xc   :  { %3819 = shalt.err (!%p3816_p4)
}
   0xd   :  { %s3823_s14 = smov 384   ;;  %s3824_s15 = smov 24  }
   0xe   :  { %34 = dma.hbm_to_vmem [thread:$0]  %s5184_s3, 18432, %s29_s12, [#allocation4], %s3823_s14, %s3823_s14, %s3824_s15  }
   0xf   :  { %3820 = dma.done.wait [#allocation4], 18432  }
  0x10   :  { %3821 = vsyncadd [#allocation4], 4294948864  ;;  %v5195_v1 = vmov 0   ;;  %vm268_vm0 = vcmask 1044480   ;;  %v3527_v4 = vld [vmem:[%s5182_s1 + $0x64] ss:$24 sps:$4 sm:$0xff]  }
  0x11   :  { %319 = vmatprep.mubr.bf16.mxu0 %v5195_v1  ;;  %379 = vmatprep.mubr.bf16.mxu1 %v5195_v1  ;;  %v3524_v2 = vld [vmem:[%s5182_s1 + $0x94] ss:$24 sps:$4 sm:$0x1f]   ;;  %v3526_v3 = vld [vmem:[%s5182_s1 + $0x90] ss:$24 sps:$4 sm:$0x1f]  }
  0x12   :  { %3522 = vset.pattern.permute.xlu1 %v5195_v1  ;;  %3523 = vset.pattern.permute.xlu0 %v5195_v1  ;;  %v270_v5 = vsel %vm268_vm0, %v3526_v3, 0  ;;  %v3529_v6 = vld [vmem:[%s5182_s1 + $0x60] ss:$24 sps:$4 sm:$0xff]   ;;  %v3530_v7 = vld [vmem:[%s5182_s1 + $0x34] ss:$24 sps:$4 sm:$0xff]   ;;  %vm243_vm1 = vcmask 474112  }
  0x13   :  { %3201 = vmatprep.subr.msk.bf16.mxu0 %vm268_vm0, %v3524_v2  ;;  %3510 = vmatprep.subr.msk.bf16.mxu1 %vm268_vm0, %v3524_v2  ;;  %v3532_v8 = vld [vmem:[%s5182_s1 + $0x30] ss:$24 sps:$4 sm:$0xff]   ;;  %v3533_v9 = vld [vmem:[%s5182_s1 + $0x4] ss:$24 sps:$4 sm:$0xff]   ;;  %v3535_v10 = vld [vmem:[%s5182_s1] ss:$24 sps:$4 sm:$0xff]  }
  0x14   :  { %296 = vmatpush1.bf16.msra.mxu0 %v270_v5  ;;  %3514 = vmatpush1.bf16.msra.mxu1 %v270_v5  ;;  %v49_v11 = vld [vmem:[%s5181_s0] sm:$0xff]  ;;  %v50_v12 = vld [vmem:[%s5181_s0 + $0x8] sm:$0xff]  ;;  %v3536_v15 = vld [vmem:[%s5182_s1 + $0x9c] ss:$24 sps:$4 sm:$0x1f]   ;;  %vm2968_vm2 = vcmask 523264  }
  0x15   :  { %297 = vmatprep.subr.bf16.mxu0 %v3527_v4  ;;  %3511 = vmatprep.subr.bf16.mxu1 %v3527_v4  ;;  %v61_v13 = vld [vmem:[%s5181_s0 + $0x60] sm:$0xff]  ;;  %v62_v14 = vld [vmem:[%s5181_s0 + $0x68] sm:$0xff]  ;;  %v3540_v17 = vld [vmem:[%s5182_s1 + $0x98] ss:$24 sps:$4 sm:$0x1f]   ;;  %v3937_v19 = vpack.c.bf16 %v50_v12, %v49_v11  ;;  %vm3070_vm3 = vcmask 130112  }
  0x16   :  { %v3538_v16 = vld [vmem:[%s5182_s1 + $0xa4] ss:$24 sps:$4 sm:$0x1f]   ;;  %v3541_v18 = vld [vmem:[%s5182_s1 + $0xa0] ss:$24 sps:$4 sm:$0x1f]   ;;  %v3939_v20 = vpack.c.bf16 %v62_v14, %v61_v13 }
  0x17   :  { %v276_v21 = vsel %vm268_vm0, %v3540_v17, 0  ;;  %v282_v22 = vsel %vm268_vm0, %v3541_v18, 0  ;;  %v3544_v23 = vld [vmem:[%s5182_s1 + $0x6c] ss:$24 sps:$4 sm:$0xff]   ;;  %v3542_v24 = vld [vmem:[%s5182_s1 + $0x68] ss:$24 sps:$4 sm:$0xff]  }
  0x18   :  { %298 = vmatpush1.bf16.msra.mxu0 %v3529_v6  ;;  %3515 = vmatpush1.bf16.msra.mxu1 %v3529_v6  ;;  %v51_v25 = vld [vmem:[%s5181_s0 + $0x10] sm:$0xff]  ;;  %v52_v27 = vld [vmem:[%s5181_s0 + $0x18] sm:$0xff]  ;;  %v3550_v36 = vld [vmem:[%s5182_s1 + $0xc] ss:$24 sps:$4 sm:$0xff]   ;;  %vm3077_vm4 = vcmask 195712   ;;  %vm3084_vm5 = vcmask 261312  }
  0x19   :  { %299 = vmatprep.subr.bf16.mxu0 %v3530_v7  ;;  %3512 = vmatprep.subr.bf16.mxu1 %v3530_v7  ;;  %v3553_v26 = vld [vmem:[%s5182_s1 + $0x74] ss:$24 sps:$4 sm:$0xff]   ;;  %v64_v29 = vld [vmem:[%s5181_s0 + $0x78] sm:$0xff]  ;;  %v3551_v30 = vld [vmem:[%s5182_s1 + $0x70] ss:$24 sps:$4 sm:$0xff]   ;;  %v66_v34 = vpack.c.bf16 %v52_v27, %v51_v25  ;;  %vm3091_vm6 = vcmask 326912  }
  0x1a   :  { %v63_v28 = vld [vmem:[%s5181_s0 + $0x70] sm:$0xff]  ;;  %v3556_v32 = vld [vmem:[%s5182_s1 + $0x44] ss:$24 sps:$4 sm:$0xff]   ;;  %v3554_v37 = vld [vmem:[%s5182_s1 + $0x40] ss:$24 sps:$4 sm:$0xff]   ;;  %vm3098_vm7 = vcmask 392512  }
  0x1b   :  { %v3547_v31 = vld [vmem:[%s5182_s1 + $0x3c] ss:$24 sps:$4 sm:$0xff]   ;;  %v3545_v33 = vld [vmem:[%s5182_s1 + $0x38] ss:$24 sps:$4 sm:$0xff]   ;;  %v3984_v35 = vpack.c.bf16 %v64_v29, %v63_v28  ;;  %v3548_v39 = vld [vmem:[%s5182_s1 + $0x8] ss:$24 sps:$4 sm:$0xff]  }
  0x1c   :  { %300 = vmatpush1.bf16.msra.mxu0 %v3532_v8  ;;  %3516 = vmatpush1.bf16.msra.mxu1 %v3532_v8  ;;  %v3559_v38 = vld [vmem:[%s5182_s1 + $0x14] ss:$24 sps:$4 sm:$0xff]   ;;  %v53_v40 = vld [vmem:[%s5181_s0 + $0x20] sm:$0xff]  ;;  %v3557_v43 = vld [vmem:[%s5182_s1 + $0x10] ss:$24 sps:$4 sm:$0xff]   ;;  %vm3105_vm8 = vcmask 458112  }
  0x1d   :  { %301 = vmatprep.subr.bf16.mxu0 %v3533_v9  ;;  %3513 = vmatprep.subr.bf16.mxu1 %v3533_v9  ;;  %v54_v41 = vld [vmem:[%s5181_s0 + $0x28] sm:$0xff]  ;;  %v55_v46 = vld [vmem:[%s5181_s0 + $0x30] sm:$0xff]  ;;  %v56_v47 = vld [vmem:[%s5181_s0 + $0x38] sm:$0xff]  ;;  %vm3112_vm9 = vcmask 523712   ;;  %vm3119_vm10 = vcmask 589312   ;;  %vm3126_vm11 = vcmask 654912  }
  0x1e   :  { %v3562_v42 = vld [vmem:[#allocation3 + $0x154] ss:$24 sps:$4 sm:$0xff]   ;;  %v67_v44 = vpack.c.bf16 %v54_v41, %v53_v40  ;;  %v3560_v45 = vld [vmem:[#allocation3 + $0x150] ss:$24 sps:$4 sm:$0xff]   ;;  %v68_v48 = vpack.c.bf16 %v56_v47, %v55_v46  ;;  %v57_v49 = vld [vmem:[%s5181_s0 + $0x40] sm:$0xff]  ;;  %vm3133_vm12 = vcmask 720512  }
  0x1f   :  { %v58_v50 = vld [vmem:[%s5181_s0 + $0x48] sm:$0xff]  ;;  %v59_v52 = vld [vmem:[%s5181_s0 + $0x50] sm:$0xff]  ;;  %v60_v53 = vld [vmem:[%s5181_s0 + $0x58] sm:$0xff]  ;;  %vm3140_vm13 = vcmask 786112   ;;  %vm3147_vm14 = vcmask 851712   ;;  %vm3154_vm15 = vcmask 917312  }
  0x20   :  { %302 = vmatpush1.bf16.msra.mxu0 %v3535_v10  ;;  %3517 = vmatpush1.bf16.msra.mxu1 %v3535_v10  ;;  %v69_v51 = vpack.c.bf16 %v58_v50, %v57_v49  ;;  %v70_v54 = vpack.c.bf16 %v60_v53, %v59_v52  ;;  %v3568_v55 = vld [vmem:[#allocation3 + $0x124] ss:$24 sps:$4 sm:$0xff]   ;;  %v3566_v56 = vld [vmem:[#allocation3 + $0x120] ss:$24 sps:$4 sm:$0xff]   ;;  %v3563_v57 = vld [vmem:[#allocation3 + $0x450] ss:$24 sps:$4 sm:$0xff]  }
  0x21   :  { %3210 = vmatprep.subr.msk.bf16.mxu1 %vm268_vm0, %v3536_v15  ;;  %3219 = vmatprep.subr.msk.bf16.mxu0 %vm268_vm0, %v3538_v16  ;;  %v3565_v58 = vld [vmem:[#allocation3 + $0x454] ss:$24 sps:$4 sm:$0xff]   ;;  %v3569_v60 = vld [vmem:[#allocation3 + $0xf0] ss:$24 sps:$4 sm:$0xff]   ;;  %v3577_v61 = vld [vmem:[#allocation3 + $0xc4] ss:$24 sps:$4 sm:$0xff]  }
  0x22   :  { %v3571_v59 = vld [vmem:[#allocation3 + $0xf4] ss:$24 sps:$4 sm:$0xff]   ;;  %v3575_v62 = vld [vmem:[#allocation3 + $0xc0] ss:$24 sps:$4 sm:$0xff]   ;;  %v3574_v0 = vld [vmem:[#allocation3 + $0x424] ss:$24 sps:$4 sm:$0xff]  }
  0x23   :  { %3202 = vmatmul.mubr.msk.bf16.vlgmr.msra.gmra.mxu0 %vm243_vm1, %v3937_v19  ;;  %3208 = vmatmul.mubr.msk.bf16.vlgmr.msra.gmra.mxu1 %vm243_vm1, %v3939_v20  ;;  %v3572_v63 = vld [vmem:[#allocation3 + $0x420] ss:$24 sps:$4 sm:$0xff]   ;;  %v3580_v2 = vld [vmem:[#allocation3 + $0x94] ss:$24 sps:$4 sm:$0xff]   ;;  %v3578_v3 = vld [vmem:[#allocation3 + $0x90] ss:$24 sps:$4 sm:$0xff]  }
  0x24   :  { %409 = vmatpush1.bf16.msra.mxu1 %v276_v21  ;;  %522 = vmatpush1.bf16.msra.mxu0 %v282_v22  ;;  %v3586_v4 = vld [vmem:[#allocation3 + $0x64] ss:$24 sps:$4 sm:$0xff]   ;;  %v3584_v5 = vld [vmem:[#allocation3 + $0x60] ss:$24 sps:$4 sm:$0xff]   ;;  %v3581_v6 = vld [vmem:[#allocation3 + $0x3f0] ss:$24 sps:$4 sm:$0xff]  }
  0x25   :  { %410 = vmatprep.subr.bf16.mxu1 %v3544_v23  ;;  %329 = vmatprep.mubr.bf16.mxu0 %v5195_v1  ;;  %v3583_v7 = vld [vmem:[#allocation3 + $0x3f4] ss:$24 sps:$4 sm:$0xff]   ;;  %v3587_v9 = vld [vmem:[#allocation3 + $0x30] ss:$24 sps:$4 sm:$0xff]   ;;  %v3595_v10 = vld [vmem:[#allocation3 + $0x4] ss:$24 sps:$4 sm:$0xff]  }
  0x26   :  { %389 = vmatprep.mubr.bf16.mxu1 %v5195_v1  ;;  %523 = vmatprep.subr.bf16.mxu0 %v3553_v26  ;;  %v3589_v8 = vld [vmem:[#allocation3 + $0x34] ss:$24 sps:$4 sm:$0xff]   ;;  %v3593_v11 = vld [vmem:[#allocation3] ss:$24 sps:$4 sm:$0xff]   ;;  %v3592_v14 = vld [vmem:[#allocation3 + $0x3c4] ss:$24 sps:$4 sm:$0xff]  }
  0x27   :  { %v3598_v12 = vld [vmem:[#allocation3 + $0x2d4] ss:$24 sps:$4 sm:$0xff]   ;;  %v3590_v13 = vld [vmem:[#allocation3 + $0x3c0] ss:$24 sps:$4 sm:$0xff]   ;;  %v3596_v15 = vld [vmem:[#allocation3 + $0x2d0] ss:$24 sps:$4 sm:$0xff]  }
  0x28   :  { %411 = vmatpush1.bf16.msra.mxu1 %v3542_v24  ;;  %524 = vmatpush1.bf16.msra.mxu0 %v3551_v30  ;;  %v3604_v16 = vld [vmem:[#allocation3 + $0x2a4] ss:$24 sps:$4 sm:$0xff]   ;;  %v3602_v17 = vld [vmem:[#allocation3 + $0x2a0] ss:$24 sps:$4 sm:$0xff]   ;;  %v3599_v18 = vld [vmem:[#allocation3 + $0x390] ss:$24 sps:$4 sm:$0xff]  }
  0x29   :  { %412 = vmatprep.subr.bf16.mxu1 %v3547_v31  ;;  %525 = vmatprep.subr.bf16.mxu0 %v3556_v32  ;;  %v3607_v21 = vld [vmem:[#allocation3 + $0x274] ss:$24 sps:$4 sm:$0xff]   ;;  %v3605_v22 = vld [vmem:[#allocation3 + $0x270] ss:$24 sps:$4 sm:$0xff]   ;;  %v3611_v23 = vld [vmem:[#allocation3 + $0x240] ss:$24 sps:$4 sm:$0xff]  }
  0x2a   :  { %v3608_v24 = vld [vmem:[#allocation3 + $0x360] ss:$24 sps:$4 sm:$0xff]   ;;  %v3610_v25 = vld [vmem:[#allocation3 + $0x364] ss:$24 sps:$4 sm:$0xff]   ;;  %v3616_v26 = vld [vmem:[#allocation3 + $0x214] ss:$24 sps:$4 sm:$0xff]  }
  0x2b   :  { %3203 = vmatmul.mubr.msk.bf16.gmra.mxu0 %vm243_vm1, %v66_v34  ;;  %3209 = vmatmul.mubr.msk.bf16.gmra.mxu1 %vm243_vm1, %v3984_v35  ;;  %v3614_v27 = vld [vmem:[#allocation3 + $0x210] ss:$24 sps:$4 sm:$0xff]   ;;  %v3622_v28 = vld [vmem:[#allocation3 + $0x1e4] ss:$24 sps:$4 sm:$0xff]   ;;  %v3620_v29 = vld [vmem:[#allocation3 + $0x1e0] ss:$24 sps:$4 sm:$0xff]  }
  0x2c   :  { %413 = vmatpush1.bf16.msra.mxu1 %v3545_v33  ;;  %339 = vmatprep.mubr.bf16.mxu0 %v5195_v1  ;;  %v3617_v30 = vld [vmem:[#allocation3 + $0x330] ss:$24 sps:$4 sm:$0xff]   ;;  %v3619_v31 = vld [vmem:[#allocation3 + $0x334] ss:$24 sps:$4 sm:$0xff]   ;;  %vm3161_vm0 = vcmask 982912  }
  0x2d   :  { %414 = vmatprep.subr.bf16.mxu1 %v3550_v36  ;;  %432 = vmatprep.mubr.bf16.mxu1 %v5195_v1  ;;  %v3625_v32 = vld [vmem:[#allocation3 + $0x1b4] ss:$24 sps:$4 sm:$0xff]   ;;  %v3623_v33 = vld [vmem:[#allocation3 + $0x1b0] ss:$24 sps:$4 sm:$0xff]   ;;  %v3629_v36 = vld [vmem:[#allocation3 + $0x180] ss:$24 sps:$4 sm:$0xff]  }
  0x2e   :  { %526 = vmatpush1.bf16.msra.mxu0 %v3554_v37  ;;  %v3626_v37 = vld [vmem:[#allocation3 + $0x300] ss:$24 sps:$4 sm:$0xff]  }
  0x2f   :  { %527 = vmatprep.subr.bf16.mxu0 %v3559_v38  ;;  %v3634_v38 = vld [vmem:[#allocation3 + $0x15c] ss:$24 sps:$4 sm:$0xff]  }
  0x30   :  { %415 = vmatpush1.bf16.msra.mxu1 %v3548_v39  ;;  %v3637_v39 = vld [vmem:[#allocation3 + $0x45c] ss:$24 sps:$4 sm:$0xff]  }
  0x31   :  { %1690 = vmatprep.subr.bf16.mxu1 %v3562_v42 }
  0x32   :  { %528 = vmatpush1.bf16.msra.mxu0 %v3557_v43 }
  0x33   :  { %3204 = vmatmul.mubr.msk.bf16.gmra.mxu0 %vm243_vm1, %v67_v44  ;;  %3211 = vmatmul.mubr.msk.bf16.vlgmr.msra.gmra.mxu1 %vm243_vm1, %v3937_v19 }
  0x34   :  { %349 = vmatprep.mubr.bf16.mxu0 %v5195_v1  ;;  %442 = vmatprep.mubr.bf16.mxu1 %v5195_v1 }
  0x35   :  { %1691 = vmatpush1.bf16.msra.mxu1 %v3560_v45  ;;  %1803 = vmatprep.subr.bf16.mxu0 %v3565_v58 }
  0x36   :  { %1692 = vmatprep.subr.bf16.mxu1 %v3568_v55 }
  0x39   :  { %1693 = vmatpush1.bf16.msra.mxu1 %v3566_v56 }
  0x3a   :  { %1694 = vmatprep.subr.bf16.mxu1 %v3571_v59 }
  0x3b   :  { %3205 = vmatmul.mubr.msk.bf16.gmra.mxu0 %vm243_vm1, %v68_v48  ;;  %3212 = vmatmul.mubr.msk.bf16.gmra.mxu1 %vm243_vm1, %v66_v34 }
  0x3c   :  { %359 = vmatprep.mubr.bf16.mxu0 %v5195_v1  ;;  %452 = vmatprep.mubr.bf16.mxu1 %v5195_v1 }
  0x3d   :  { %1695 = vmatpush1.bf16.msra.mxu1 %v3569_v60 }
  0x3e   :  { %1696 = vmatprep.subr.bf16.mxu1 %v3577_v61 }
  0x41   :  { %1697 = vmatpush1.bf16.msra.mxu1 %v3575_v62 }
  0x42   :  { %1698 = vmatprep.subr.bf16.mxu1 %v3580_v2 }
  0x43   :  { %3206 = vmatmul.mubr.msk.bf16.gmra.mxu0 %vm243_vm1, %v69_v51  ;;  %3213 = vmatmul.mubr.msk.bf16.gmra.mxu1 %vm243_vm1, %v67_v44 }
  0x44   :  { %369 = vmatprep.mubr.bf16.mxu0 %v5195_v1  ;;  %462 = vmatprep.mubr.bf16.mxu1 %v5195_v1 }
  0x45   :  { %1699 = vmatpush1.bf16.msra.mxu1 %v3578_v3  ;;  %v5191_v3 = vlaneseq }
  0x46   :  { %1700 = vmatprep.subr.bf16.mxu1 %v3586_v4 }
  0x49   :  { %1701 = vmatpush1.bf16.msra.mxu1 %v3584_v5 }
  0x4a   :  { %1702 = vmatprep.subr.bf16.mxu1 %v3589_v8  ;;  %v4116_v8 = vshrl.u32 %v5191_v3, 7 }
  0x4b   :  { %3207 = vmatmul.mubr.msk.bf16.gmra.mxu0 %vm243_vm1, %v70_v54  ;;  %3214 = vmatmul.mubr.msk.bf16.gmra.mxu1 %vm243_vm1, %v68_v48 }
  0x4c   :  { %472 = vmatprep.mubr.bf16.mxu1 %v5195_v1  ;;  %545 = vmatprep.mubr.bf16.mxu0 %v5195_v1  ;;  %5220 = vst [vmem:[#allocation10_spill] sm:$0xff] %v4116_v8 }
  0x4d   :  { %1703 = vmatpush1.bf16.msra.mxu1 %v3587_v9 }
  0x4e   :  { %1704 = vmatprep.subr.bf16.mxu1 %v3595_v10 }
  0x51   :  { %1705 = vmatpush1.bf16.msra.mxu1 %v3593_v11 }
  0x52   :  { %1706 = vmatprep.subr.bf16.mxu1 %v3598_v12 }
  0x53   :  { %3215 = vmatmul.mubr.msk.bf16.gmra.mxu1 %vm243_vm1, %v69_v51  ;;  %3220 = vmatmul.mubr.msk.bf16.vlgmr.msra.gmra.mxu0 %vm243_vm1, %v3937_v19  ;;  %v3601_v19 = vld [vmem:[#allocation3 + $0x394] ss:$24 sps:$4 sm:$0xff]  }
  0x54   :  { %482 = vmatprep.mubr.bf16.mxu1 %v5195_v1  ;;  %555 = vmatprep.mubr.bf16.mxu0 %v5195_v1 }
  0x55   :  { %1804 = vmatpush1.bf16.msra.mxu0 %v3563_v57  ;;  %1707 = vmatpush2.bf16.msra.mxu1 %v3596_v15 }
  0x56   :  { %1805 = vmatprep.subr.bf16.mxu0 %v3574_v0  ;;  %1708 = vmatprep.subr.bf16.mxu1 %v3604_v16  ;;  %v97_v16 = vld [vmem:[%s5183_s2] sm:$0x3f] }
  0x59   :  { %1806 = vmatpush1.bf16.msra.mxu0 %v3572_v63  ;;  %1709 = vmatpush2.bf16.msra.mxu1 %v3602_v17  ;;  %v5194_v17 = vsub.s32 1, %v4116_v8 }
  0x5a   :  { %1807 = vmatprep.subr.bf16.mxu0 %v3583_v7  ;;  %1710 = vmatprep.subr.bf16.mxu1 %v3607_v21 }
  0x5b   :  { %3216 = vmatmul.mubr.msk.bf16.gmra.mxu1 %vm243_vm1, %v70_v54  ;;  %3221 = vmatmul.mubr.msk.bf16.gmra.mxu0 %vm243_vm1, %v66_v34  ;;  %v3631_v34 = vld [vmem:[#allocation3 + $0x184] ss:$24 sps:$4 sm:$0xff]  }
  0x5c   :  { %492 = vmatprep.mubr.bf16.mxu1 %v5195_v1  ;;  %565 = vmatprep.mubr.bf16.mxu0 %v5195_v1 }
  0x5d   :  { %1808 = vmatpush1.bf16.msra.mxu0 %v3581_v6  ;;  %1711 = vmatpush2.bf16.msra.mxu1 %v3605_v22  ;;  %v5192_v22 = vsub.s32 3, %v4116_v8 }
  0x5e   :  { %1809 = vmatprep.subr.bf16.mxu0 %v3592_v14 }
  0x61   :  { %1810 = vmatpush1.bf16.msra.mxu0 %v3590_v13  ;;  %v4127_v13 = vsub.s32 0, %v4116_v8 }
  0x62   :  { %1811 = vmatprep.subr.bf16.mxu0 %v3601_v19 }
  0x63   :  { %3217 = vmatmul.mubr.msk.bf16.gmra.mxu1 %vm243_vm1, %v3939_v20  ;;  %3222 = vmatmul.mubr.msk.bf16.gmra.mxu0 %vm243_vm1, %v67_v44  ;;  %5221 = vst [vmem:[#allocation11_spill] sm:$0xff] %v4127_v13  ;;  %v4142_v21 = vrot.slane %v97_v16, %v4127_v13 }
  0x64   :  { %502 = vmatprep.mubr.bf16.mxu1 %v5195_v1  ;;  %575 = vmatprep.mubr.bf16.mxu0 %v5195_v1 }
  0x65   :  { %1812 = vmatpush1.bf16.msra.mxu0 %v3599_v18 }
  0x66   :  { %1813 = vmatprep.subr.bf16.mxu0 %v3610_v25  ;;  %v5193_v25 = vsub.s32 2, %v4116_v8 }
  0x69   :  { %1814 = vmatpush1.bf16.msra.mxu0 %v3608_v24  ;;  %v4151_v24 = vrot.slane %v97_v16, %v5194_v17 }
  0x6a   :  { %1815 = vmatprep.subr.bf16.mxu0 %v3619_v31 }
  0x6b   :  { %3218 = vmatmul.mubr.msk.bf16.gmra.mxu1 %vm243_vm1, %v3984_v35  ;;  %3223 = vmatmul.mubr.msk.bf16.gmra.mxu0 %vm243_vm1, %v68_v48 }
  0x6c   :  { %585 = vmatprep.mubr.bf16.mxu0 %v5195_v1 }
  0x6d   :  { %1816 = vmatpush1.bf16.msra.mxu0 %v3617_v30 }
  0x73   :  { %3224 = vmatmul.mubr.msk.bf16.gmra.mxu0 %vm243_vm1, %v69_v51 }
  0x74   :  { %595 = vmatprep.mubr.bf16.mxu0 %v5195_v1 }
  0x7b   :  { %3225 = vmatmul.mubr.msk.bf16.gmra.mxu0 %vm243_vm1, %v70_v54 }
  0x7c   :  { %605 = vmatprep.mubr.bf16.mxu0 %v5195_v1 }
  0x83   :  { %3226 = vmatmul.mubr.msk.bf16.gmra.mxu0 %vm243_vm1, %v3939_v20  ;;  %v3613_v20 = vld [vmem:[#allocation3 + $0x244] ss:$24 sps:$4 sm:$0xff]  }
  0x84   :  { %615 = vmatprep.mubr.bf16.mxu0 %v5195_v1  ;;  %1712 = vmatprep.subr.bf16.mxu1 %v3613_v20 }
  0x85   :  { %1713 = vmatpush2.bf16.msra.mxu1 %v3611_v23 }
  0x86   :  { %1714 = vmatprep.subr.bf16.mxu1 %v3616_v26 }
  0x89   :  { %1715 = vmatpush2.bf16.msra.mxu1 %v3614_v27 }
  0x8a   :  { %1716 = vmatprep.subr.bf16.mxu1 %v3622_v28  ;;  %v5197_v28 = vsub.s32 4, %v4116_v8 }
  0x8b   :  { %3227 = vmatmul.mubr.msk.bf16.gmra.mxu0 %vm243_vm1, %v3984_v35  ;;  %v3628_v35 = vld [vmem:[#allocation3 + $0x304] ss:$24 sps:$4 sm:$0xff]   ;;  %vm3168_vm1 = vcmask 1048512  }
  0x8c   :  { %1835 = vmatprep.mubr.bf16.mxu0 %v5195_v1  ;;  %1817 = vmatprep.subr.bf16.mxu0 %v3628_v35 }
  0x8d   :  { %1717 = vmatpush2.bf16.msra.mxu1 %v3620_v29  ;;  %1818 = vmatpush1.bf16.msra.mxu0 %v3626_v37  ;;  %v5198_v29 = vsub.s32 5, %v4116_v8 }
  0x8e   :  { %1718 = vmatprep.subr.bf16.mxu1 %v3625_v32  ;;  %2029 = vmatprep.subr.bf16.mxu0 %v3637_v39  ;;  %v4166_v32 = vrot.slane %v97_v16, %v5192_v22  ;;  %v4186_v39 = vrot.slane %v97_v16, %v5193_v25 }
  0x91   :  { %1719 = vmatpush2.bf16.msra.mxu1 %v3623_v33 }
  0x92   :  { %1720 = vmatprep.subr.bf16.mxu1 %v3631_v34 }
  0x95   :  { %1721 = vmatpush2.bf16.msra.mxu1 %v3629_v36 }
  0x96   :  { %1916 = vmatprep.subr.bf16.mxu1 %v3634_v38 }
  0xe3   :  { %v321_v40 = vpop.f32.mrf.mxu0  ;;  %v381_v41 = vpop.f32.mrf.mxu1 }
  0xe4   :  { %v322_v30 = vadd.f32 %v321_v40, %v4142_v21  ;;  %v4162_v31 = vadd.f32 %v381_v41, %v4142_v21 }
  0xe5   :  { %v323_v42 = vpop.f32.mrf.mxu0  ;;  %v4075_v43 = vpop.f32.mrf.mxu1 }
  0xe6   :  { %5216 = vst [vmem:[#allocation6_spill] sm:$0xff] %v4075_v43  ;;  %v4173_v35 = vadd.f32 %v323_v42, %v4151_v24  ;;  %v626_v3 = vmax.f32 %v322_v30, 0.0 }
  0xe7   :  { %v325_v44 = vpop.f32.mrf.mxu0  ;;  %v385_v45 = vpop.f32.mrf.mxu1 }
  0xe8   :  { %v4176_v36 = vadd.f32 %v325_v44, %v4142_v21  ;;  %v4179_v37 = vadd.f32 %v385_v45, %v4142_v21  ;;  %v4200_v45 = vrot.slane %v97_v16, %v5197_v28  ;;  %v627_v1 = vmax.f32 %v4173_v35, 0.0 }
  0xe9   :  { %v327_v46 = vpop.f32.mrf.mxu0  ;;  %v4077_v47 = vpop.f32.mrf.mxu1 }
  0xea   :  { %5217 = vst [vmem:[#allocation7_spill] sm:$0xff] %v4077_v47  ;;  %v4182_v38 = vadd.f32 %v327_v46, %v4151_v24  ;;  %v4204_v46 = vrot.slane %v97_v16, %v5198_v29  ;;  %v632_v28 = vmax.f32 %v4176_v36, 0.0 }
  0xeb   :  { %v331_v48 = vpop.f32.mrf.mxu0  ;;  %v391_v49 = vpop.f32.mrf.mxu1 }
  0xec   :  { %v4193_v42 = vadd.f32 %v331_v48, %v4142_v21  ;;  %v4196_v44 = vadd.f32 %v391_v49, %v4142_v21 }
  0xed   :  { %v333_v50 = vpop.f32.mrf.mxu0  ;;  %v4079_v51 = vpop.f32.mrf.mxu1 }
  0xee   :  { %5218 = vst [vmem:[#allocation8_spill] sm:$0xff] %v4079_v51  ;;  %5225 = vst [vmem:[#allocation15_spill] sm:$0xff] %v4196_v44  ;;  %v4208_v25 = vadd.f32 %v333_v50, %v4151_v24 }
  0xef   :  { %v4081_v52 = vpop.f32.mrf.mxu0  ;;  %v4083_v53 = vpop.f32.mrf.mxu1 }
  0xf0   :  { %v4219_v16 = vadd.f32 %v4081_v52, %v4142_v21  ;;  %v4223_v30 = vadd.f32 %v4083_v53, %v4142_v21 }
  0xf1   :  { %v4085_v54 = vpop.f32.mrf.mxu0  ;;  %v4087_v55 = vpop.f32.mrf.mxu1 }
  0xf2   :  { %5219 = vst [vmem:[#allocation9_spill] sm:$0xff] %v4087_v55  ;;  %5227 = vst [vmem:[#allocation17_spill] sm:$0xff] %v4223_v30  ;;  %v4229_v29 = vadd.f32 %v4085_v54, %v4151_v24 }
  0xf3   :  { %v4089_v56 = vpop.f32.mrf.mxu0  ;;  %v4091_v57 = vpop.f32.mrf.mxu1 }
  0xf4   :  { %v4233_v35 = vadd.f32 %v4089_v56, %v4142_v21  ;;  %v435_v50 = vadd.f32 %v4091_v57, %v4186_v39 }
  0xf5   :  { %v4093_v58 = vpop.f32.mrf.mxu0  ;;  %v436_v59 = vpop.f32.mrf.mxu1 }
  0xf6   :  { %v437_v48 = vadd.f32 %v436_v59, %v4166_v32  ;;  %v633_v59 = vmax.f32 %v4182_v38, 0.0  ;;  %v4246_v8 = vadd.f32 %v4093_v58, %v4151_v24  ;;  %v628_v47 = vmax.f32 %v435_v50, 0.0 }
  0xf7   :  { %v4095_v60 = vpop.f32.mrf.mxu0  ;;  %v4097_v61 = vpop.f32.mrf.mxu1 }
  0xf8   :  { %v629_v56 = vmax.f32 %v437_v48, 0.0  ;;  %v4255_v57 = vadd.f32 %v4095_v60, %v4142_v21 }
  0xf9   :  { %v4099_v62 = vpop.f32.mrf.mxu0  ;;  %v4101_v63 = vpop.f32.mrf.mxu1 }
  0xfa   :  { %v441_v38 = vadd.f32 %v4101_v63, %v4166_v32  ;;  %v439_v63 = vadd.f32 %v4097_v61, %v4186_v39  ;;  %v722_v58 = vmax.f32 %v626_v3, %v629_v56 }
  0xfb   :  { %v4103_v0 = vpop.f32.mrf.mxu0  ;;  %v4105_v2 = vpop.f32.mrf.mxu1 }
  0xfc   :  { %v635_v43 = vmax.f32 %v441_v38, 0.0  ;;  %v4270_v60 = vadd.f32 %v4103_v0, %v4142_v21  ;;  %v634_v50 = vmax.f32 %v439_v63, 0.0  ;;  %v4281_v38 = vadd.f32 %v4105_v2, %v4186_v39  ;;  %v3644_v63 = vld [vmem:[#allocation3 + $0x428] ss:$24 sps:$4 sm:$0xff]  }
  0xfd   :  { %v4107_v4 = vpop.f32.mrf.mxu0  ;;  %v4109_v5 = vpop.f32.mrf.mxu1 }
  0xfe   :  { %v447_v61 = vadd.f32 %v4109_v5, %v4166_v32  ;;  %v4285_v0 = vadd.f32 %v4107_v4, %v4151_v24 }
  0xff   :  { %v4111_v6 = vpop.f32.mrf.mxu0  ;;  %v4113_v7 = vpop.f32.mrf.mxu1 }
 0x101   :  { %v4118_v9 = vpop.f32.mrf.mxu0  ;;  %v4120_v10 = vpop.f32.mrf.mxu1 }
 0x102   :  { %v451_v2 = vadd.f32 %v4120_v10, %v4166_v32 }
 0x103   :  { %v4122_v11 = vpop.f32.mrf.mxu0  ;;  %v4124_v12 = vpop.f32.mrf.mxu1 }
 0x105   :  { %v4129_v14 = vpop.f32.mrf.mxu0  ;;  %v4131_v15 = vpop.f32.mrf.mxu1 }
 0x107   :  { %v4137_v18 = vpop.f32.mrf.mxu0  ;;  %v4139_v19 = vpop.f32.mrf.mxu1 }
 0x109   :  { %v4145_v20 = vpop.f32.mrf.mxu0  ;;  %v4147_v23 = vpop.f32.mrf.mxu1 }
 0x10b   :  { %v4154_v26 = vpop.f32.mrf.mxu0  ;;  %v4156_v27 = vpop.f32.mrf.mxu1 }
 0x10c   :  { %5222 = vst [vmem:[#allocation12_spill] sm:$0xff] %v4154_v26 }
 0x10d   :  { %v4168_v33 = vpop.f32.mrf.mxu0  ;;  %v4170_v34 = vpop.f32.mrf.mxu1 }
 0x10e   :  { %5223 = vst [vmem:[#allocation13_spill] sm:$0xff] %v4168_v33  ;;  %v725_v33 = vmax.f32 %v632_v28, %v635_v43  ;;  %v4301_v43 = vadd.f32 %v4111_v6, %v4142_v21  ;;  %v449_v28 = vadd.f32 %v4113_v7, %v4186_v39  ;;  %v647_v6 = vmax.f32 %v451_v2, 0.0  ;;  %v3635_v7 = vld [vmem:[#allocation3 + $0x458] ss:$24 sps:$4 sm:$0xff]  }
 0x10f   :  { %v4188_v40 = vpop.f32.mrf.mxu0  ;;  %v4190_v41 = vpop.f32.mrf.mxu1 }
 0x110   :  { %5224 = vst [vmem:[#allocation14_spill] sm:$0xff] %v4188_v40  ;;  %v641_v40 = vmax.f32 %v447_v61, 0.0 }
 0x111   :  { %v4211_v17 = vpop.f32.mrf.mxu0  ;;  %v4213_v49 = vpop.f32.mrf.mxu1 }
 0x112   :  { %5226 = vst [vmem:[#allocation16_spill] sm:$0xff] %v4211_v17 }
 0x113   :  { %v4235_v36 = vpop.f32.mrf.mxu1  ;;  %v547_v52 = vpop.f32.mrf.mxu0 }
 0x114   :  { %v548_v13 = vadd.f32 %v547_v52, %v4200_v45  ;;  %v4263_v52 = vadd.f32 %v4099_v62, %v4151_v24 }
 0x115   :  { %v4249_v55 = vpop.f32.mrf.mxu1  ;;  %v549_v22 = vpop.f32.mrf.mxu0 }
 0x116   :  { %v550_v54 = vadd.f32 %v549_v22, %v4204_v46  ;;  %v630_v26 = vmax.f32 %v548_v13, 0.0 }
 0x117   :  { %v4266_v53 = vpop.f32.mrf.mxu1  ;;  %v551_v51 = vpop.f32.mrf.mxu0 }
 0x118   :  { %5228 = vst [vmem:[#allocation18_spill] sm:$0xff] %v4266_v53  ;;  %v552_v62 = vadd.f32 %v551_v51, %v4200_v45  ;;  %v631_v3 = vmax.f32 %v550_v54, 0.0  ;;  %v723_v53 = vmax.f32 %v627_v1, %v630_v26 }
 0x119   :  { %v4276_v17 = vpop.f32.mrf.mxu1  ;;  %v553_v22 = vpop.f32.mrf.mxu0 }
 0x11a   :  { %v636_v13 = vmax.f32 %v552_v62, 0.0  ;;  %v554_v51 = vadd.f32 %v553_v22, %v4204_v46  ;;  %v640_v62 = vmax.f32 %v4281_v38, 0.0  ;;  %v724_v10 = vmax.f32 %v628_v47, %v631_v3  ;;  %v3640_v47 = vld [vmem:[#allocation3 + $0x12c] ss:$24 sps:$4 sm:$0xff]  }
 0x11b   :  { %v4289_v56 = vpop.f32.mrf.mxu1  ;;  %v557_v48 = vpop.f32.mrf.mxu0  ;;  %v4310_v38 = vpack.c.bf16 %v725_v33, %v722_v58  ;;  %v3646_v58 = vld [vmem:[#allocation3 + $0x42c] ss:$24 sps:$4 sm:$0xff]  }
 0x11c   :  { %v726_v30 = vmax.f32 %v633_v59, %v636_v13  ;;  %v637_v4 = vmax.f32 %v554_v51, 0.0  ;;  %v558_v44 = vadd.f32 %v557_v48, %v4200_v45  ;;  %v3632_v13 = vld [vmem:[#allocation3 + $0x158] ss:$24 sps:$4 sm:$0xff]   ;;  %v4314_v51 = vadd.f32 %v4118_v9, %v4151_v24 }
 0x11d   :  { %v4295_v5 = vpop.f32.mrf.mxu1  ;;  %v559_v54 = vpop.f32.mrf.mxu0  ;;  %5230 = vst [vmem:[#allocation20_spill] sm:$0xff] %v4310_v38 }
 0x11e   :  { %v727_v1 = vmax.f32 %v634_v50, %v637_v4  ;;  %v560_v26 = vadd.f32 %v559_v54, %v4204_v46  ;;  %v4308_v61 = vpack.c.bf16 %v726_v30, %v723_v53  ;;  %v5231_v50 = vmax.f32 %v4193_v42, 0.0 }
 0x11f   :  { %v4306_v59 = vpop.f32.mrf.mxu1  ;;  %v561_v48 = vpop.f32.mrf.mxu0  ;;  %v4321_v4 = vadd.f32 %v4122_v11, %v4142_v21  ;;  %v642_v33 = vmax.f32 %v558_v44, 0.0  ;;  %v4331_v54 = vadd.f32 %v4124_v12, %v4186_v39  ;;  %v646_v42 = vmax.f32 %v449_v28, 0.0 }
 0x120   :  { %5229 = vst [vmem:[#allocation19_spill] sm:$0xff] %v4308_v61  ;;  %v562_v22 = vadd.f32 %v561_v48, %v4200_v45  ;;  %v728_v3 = vmax.f32 %v5231_v50, %v641_v40  ;;  %v4323_v30 = vpack.c.bf16 %v727_v1, %v724_v10  ;;  %1722 = vmatprep.mubr.bf16.mxu1 %v4308_v61  ;;  %v643_v10 = vmax.f32 %v560_v26, 0.0  ;;  %v3638_v50 = vld [vmem:[#allocation3 + $0x128] ss:$24 sps:$4 sm:$0xff]  }
 0x121   :  { %v4326_v53 = vpop.f32.mrf.mxu1  ;;  %v563_v9 = vpop.f32.mrf.mxu0  ;;  %v4335_v40 = vadd.f32 %v4131_v15, %v4166_v32  ;;  %1723 = vmatmul.mubr.bf16.vlgmr.msra.gmra.mxu1 %v4310_v38  ;;  %v4340_v44 = vadd.f32 %v4129_v14, %v4151_v24  ;;  %v461_v28 = vadd.f32 %v4147_v23, %v4166_v32  ;;  %v5234_v14 = vmax.f32 %v4229_v29, 0.0  ;;  %v3655_v23 = vld [vmem:[#allocation3 + $0x3fc] ss:$24 sps:$4 sm:$0xff]  }
 0x122   :  { %5232 = vst [vmem:[#allocation21_spill] sm:$0xff] %v4323_v30  ;;  %v648_v11 = vmax.f32 %v562_v22, 0.0  ;;  %v564_v1 = vadd.f32 %v563_v9, %v4204_v46  ;;  %1836 = vmatmul.mubr.bf16.vlgmr.msra.gmra.mxu0 %v4323_v30  ;;  %1917 = vmatpush1.bf16.msra.mxu1 %v3632_v13  ;;  %v5233_v22 = vmax.f32 %v4219_v16, 0.0  ;;  %v3643_v9 = vld [vmem:[#allocation3 + $0xfc] ss:$24 sps:$4 sm:$0xff]   ;;  %v5235_v30 = vmax.f32 %v4208_v25, 0.0 }
 0x123   :  { %v4344_v12 = vpop.f32.mrf.mxu1  ;;  %v567_v48 = vpop.f32.mrf.mxu0  ;;  %2030 = vmatpush1.bf16.msra.mxu0 %v3635_v7  ;;  %1918 = vmatprep.subr.bf16.mxu1 %v3640_v47  ;;  %v653_v7 = vmax.f32 %v4335_v40, 0.0  ;;  %v4362_v47 = vadd.f32 %v4139_v19, %v4186_v39  ;;  %v659_v40 = vmax.f32 %v461_v28, 0.0 }
 0x124   :  { %v731_v2 = vmax.f32 %v5233_v22, %v647_v6  ;;  %v732_v26 = vmax.f32 %v5234_v14, %v648_v11  ;;  %v729_v38 = vmax.f32 %v5235_v30, %v642_v33  ;;  %v649_v61 = vmax.f32 %v564_v1, 0.0  ;;  %2031 = vmatprep.subr.bf16.mxu0 %v3646_v58  ;;  %v3641_v14 = vld [vmem:[#allocation3 + $0xf8] ss:$24 sps:$4 sm:$0xff]  }
 0x125   :  { %v568_v15 = vadd.f32 %v567_v48, %v4200_v45  ;;  %v496_v16 = vpop.f32.mrf.mxu1  ;;  %v569_v6 = vpop.f32.mrf.mxu0  ;;  %v5236_v22 = vmov 0   ;;  %v730_v30 = vmax.f32 %v640_v62, %v643_v10  ;;  %v3649_v62 = vld [vmem:[#allocation3 + $0xcc] ss:$24 sps:$4 sm:$0xff]  }
 0x126   :  { %1845 = vmatprep.mubr.bf16.mxu0 %v5236_v22  ;;  %v497_v25 = vadd.f32 %v496_v16, %v4166_v32  ;;  %v733_v33 = vmax.f32 %v646_v42, %v649_v61  ;;  %v570_v11 = vadd.f32 %v569_v6, %v4204_v46  ;;  %1919 = vmatpush1.bf16.msra.mxu1 %v3638_v50  ;;  %v658_v16 = vmax.f32 %v4362_v47, 0.0  ;;  %v3652_v47 = vld [vmem:[#allocation3 + $0x9c] ss:$24 sps:$4 sm:$0xff]  }
 0x127   :  { %v4366_v1 = vpop.f32.mrf.mxu1  ;;  %v571_v48 = vpop.f32.mrf.mxu0  ;;  %v4368_v58 = vpack.c.bf16 %v732_v26, %v729_v38  ;;  %v4372_v19 = vpack.c.bf16 %v731_v2, %v728_v3  ;;  %1920 = vmatprep.subr.bf16.mxu1 %v3643_v9  ;;  %2032 = vmatpush1.bf16.msra.mxu0 %v3644_v63  ;;  %v4376_v61 = vadd.f32 %v4137_v18, %v4142_v21  ;;  %v654_v38 = vmax.f32 %v568_v15, 0.0  ;;  %v3653_v3 = vld [vmem:[#allocation3 + $0x3f8] ss:$24 sps:$4 sm:$0xff]  }
 0x128   :  { %v572_v29 = vadd.f32 %v571_v48, %v4200_v45  ;;  %v4380_v42 = vadd.f32 %v4170_v34, %v4166_v32  ;;  %v4383_v28 = vpack.c.bf16 %v733_v33, %v730_v30  ;;  %2033 = vmatprep.subr.bf16.mxu0 %v3655_v23  ;;  %v4387_v63 = vadd.f32 %v4213_v49, %v4166_v32  ;;  %v3664_v34 = vld [vmem:[#allocation3 + $0x3cc] ss:$24 sps:$4 sm:$0xff]  }
 0x129   :  { %1732 = vmatprep.mubr.bf16.mxu1 %v4368_v58  ;;  %v500_v10 = vpop.f32.mrf.mxu1  ;;  %v573_v50 = vpop.f32.mrf.mxu0  ;;  %v701_v2 = vmax.f32 %v497_v25, 0.0  ;;  %v5237_v15 = vmax.f32 %v4233_v35, 0.0  ;;  %v655_v6 = vmax.f32 %v570_v11, 0.0  ;;  %v5238_v25 = vmax.f32 %v4255_v57, 0.0 }
 0x12a   :  { %v660_v18 = vmax.f32 %v572_v29, 0.0  ;;  %v501_v26 = vadd.f32 %v500_v10, %v4166_v32  ;;  %1733 = vmatmul.mubr.bf16.gmra.mxu1 %v4372_v19  ;;  %v574_v30 = vadd.f32 %v573_v50, %v4204_v46  ;;  %1846 = vmatmul.mubr.bf16.gmra.mxu0 %v4383_v28  ;;  %v3647_v29 = vld [vmem:[#allocation3 + $0xc8] ss:$24 sps:$4 sm:$0xff]   ;;  %v5239_v48 = vmax.f32 %v4263_v52, 0.0 }
 0x12b   :  { %v734_v9 = vmax.f32 %v5237_v15, %v653_v7  ;;  %1921 = vmatpush1.bf16.msra.mxu1 %v3641_v14  ;;  %v4396_v49 = vpop.f32.mrf.mxu1  ;;  %v577_v23 = vpop.f32.mrf.mxu0  ;;  %v737_v33 = vmax.f32 %v5238_v25, %v659_v40  ;;  %1855 = vmatprep.mubr.bf16.mxu0 %v5236_v22  ;;  %v4406_v11 = vadd.f32 %v4156_v27, %v4186_v39  ;;  %v665_v14 = vmax.f32 %v4380_v42, 0.0  ;;  %v3673_v42 = vld [vmem:[#allocation3 + $0x39c] ss:$24 sps:$4 sm:$0xff]  }
 0x12c   :  { %v738_v10 = vmax.f32 %v5239_v48, %v660_v18  ;;  %v707_v35 = vmax.f32 %v501_v26, 0.0  ;;  %v578_v7 = vadd.f32 %v577_v23, %v4200_v45  ;;  %1922 = vmatprep.subr.bf16.mxu1 %v3649_v62  ;;  %v5240_v50 = vmax.f32 %v4246_v8, 0.0  ;;  %2034 = vmatpush1.bf16.msra.mxu0 %v3653_v3  ;;  %v3662_v18 = vld [vmem:[#allocation3 + $0x3c8] ss:$24 sps:$4 sm:$0xff]  }
 0x12d   :  { %v661_v40 = vmax.f32 %v574_v30, 0.0  ;;  %v506_v15 = vpop.f32.mrf.mxu1  ;;  %v579_v52 = vpop.f32.mrf.mxu0  ;;  %v671_v26 = vmax.f32 %v4387_v63, 0.0  ;;  %v5241_v62 = vmax.f32 %v4162_v31, 0.0  ;;  %v5242_v25 = vmax.f32 %v4179_v37, 0.0  ;;  %2035 = vmatprep.subr.bf16.mxu0 %v3664_v34  ;;  %v3650_v31 = vld [vmem:[#allocation3 + $0x98] ss:$24 sps:$4 sm:$0xff]  }
 0x12e   :  { %v735_v57 = vmax.f32 %v5240_v50, %v654_v38  ;;  %v507_v27 = vadd.f32 %v506_v15, %v4166_v32  ;;  %v5243_v8 = vmax.f32 %v4331_v54, 0.0  ;;  %v580_v50 = vadd.f32 %v579_v52, %v4204_v46  ;;  %v3658_v54 = vld [vmem:[#allocation3 + $0x6c] ss:$24 sps:$4 sm:$0xff]  }
 0x12f   :  { %v758_v23 = vmax.f32 %v5241_v62, %v701_v2  ;;  %v761_v48 = vmax.f32 %v5242_v25, %v707_v35  ;;  %v739_v30 = vmax.f32 %v658_v16, %v661_v40  ;;  %1923 = vmatpush1.bf16.msra.mxu1 %v3647_v29  ;;  %v4420_v3 = vpop.f32.mrf.mxu1  ;;  %v581_v63 = vpop.f32.mrf.mxu0  ;;  %v4426_v37 = vadd.f32 %v4145_v20, %v4151_v24  ;;  %v3671_v20 = vld [vmem:[#allocation3 + $0x398] ss:$24 sps:$4 sm:$0xff]  }
 0x130   :  { %v736_v38 = vmax.f32 %v5243_v8, %v655_v6  ;;  %v4422_v13 = vpack.c.bf16 %v738_v10, %v735_v57  ;;  %v666_v2 = vmax.f32 %v578_v7, 0.0  ;;  %v582_v34 = vadd.f32 %v581_v63, %v4200_v45  ;;  %1924 = vmatprep.subr.bf16.mxu1 %v3652_v47  ;;  %2036 = vmatpush1.bf16.msra.mxu0 %v3662_v18  ;;  %v5248_v63 = vld [vmem:[#allocation15_spill] sm:$0xff] }
 0x131   :  { %v4429_v35 = vpack.c.bf16 %v737_v33, %v734_v9  ;;  %v664_v16 = vmax.f32 %v4406_v11, 0.0  ;;  %v469_v6 = vadd.f32 %v4190_v41, %v4186_v39  ;;  %v510_v29 = vpop.f32.mrf.mxu1  ;;  %v583_v10 = vpop.f32.mrf.mxu0  ;;  %v4437_v7 = vpack.c.bf16 %v761_v48, %v758_v23  ;;  %2037 = vmatprep.subr.bf16.mxu0 %v3673_v42  ;;  %v3682_v41 = vld [vmem:[#allocation3 + $0x36c] ss:$24 sps:$4 sm:$0xff]  }
 0x132   :  { %1742 = vmatprep.mubr.bf16.mxu1 %v4422_v13  ;;  %v4435_v57 = vpack.c.bf16 %v739_v30, %v736_v38  ;;  %v5244_v9 = vmax.f32 %v4270_v60, 0.0  ;;  %v713_v47 = vmax.f32 %v507_v27, 0.0  ;;  %v672_v40 = vmax.f32 %v582_v34, 0.0  ;;  %v5250_v34 = vld [vmem:[#allocation17_spill] sm:$0xff] }
 0x133   :  { %v511_v11 = vadd.f32 %v510_v29, %v4166_v32  ;;  %1743 = vmatmul.mubr.bf16.gmra.mxu1 %v4429_v35  ;;  %v5245_v15 = vmax.f32 %v4301_v43, 0.0  ;;  %v481_v18 = vadd.f32 %v4276_v17, %v4166_v32  ;;  %v667_v62 = vmax.f32 %v580_v50, 0.0  ;;  %v587_v60 = vpop.f32.mrf.mxu0  ;;  %v3661_v17 = vld [vmem:[#allocation3 + $0x3c] ss:$24 sps:$4 sm:$0xff]  }
 0x134   :  { %v740_v33 = vmax.f32 %v5244_v9, %v665_v14  ;;  %v584_v23 = vadd.f32 %v583_v10, %v4204_v46  ;;  %1856 = vmatmul.mubr.bf16.gmra.mxu0 %v4435_v57  ;;  %1925 = vmatpush1.bf16.msra.mxu1 %v3650_v31  ;;  %v3656_v14 = vld [vmem:[#allocation3 + $0x68] ss:$24 sps:$4 sm:$0xff]   ;;  %v5246_v25 = vmax.f32 %v4285_v0, 0.0  ;;  %v5247_v27 = vmax.f32 %v4314_v51, 0.0 }
 0x135   :  { %v743_v52 = vmax.f32 %v5245_v15, %v671_v26  ;;  %v719_v8 = vmax.f32 %v511_v11, 0.0  ;;  %v588_v43 = vadd.f32 %v587_v60, %v4200_v45  ;;  %1926 = vmatprep.subr.bf16.mxu1 %v3658_v54  ;;  %1865 = vmatprep.mubr.bf16.mxu0 %v5236_v22  ;;  %v670_v26 = vmax.f32 %v469_v6, 0.0  ;;  %v589_v50 = vpop.f32.mrf.mxu0  ;;  %v3680_v51 = vld [vmem:[#allocation3 + $0x368] ss:$24 sps:$4 sm:$0xff]  }
 0x136   :  { %v741_v48 = vmax.f32 %v5246_v25, %v666_v2  ;;  %v744_v42 = vmax.f32 %v5247_v27, %v672_v40  ;;  %v4457_v38 = vadd.f32 %v4235_v36, %v4186_v39  ;;  %v477_v30 = vadd.f32 %v4249_v55, %v4166_v32  ;;  %2038 = vmatpush1.bf16.msra.mxu0 %v3671_v20  ;;  %v3691_v36 = vld [vmem:[#allocation3 + $0x33c] ss:$24 sps:$4 sm:$0xff]   ;;  %v5252_v9 = vld [vmem:[#allocation18_spill] sm:$0xff] }
 0x137   :  { %v673_v0 = vmax.f32 %v584_v23, 0.0  ;;  %v5249_v31 = vmax.f32 %v5248_v63, 0.0  ;;  %v5251_v54 = vmax.f32 %v5250_v34, 0.0  ;;  %v590_v10 = vadd.f32 %v589_v50, %v4204_v46  ;;  %2039 = vmatprep.subr.bf16.mxu0 %v3682_v41  ;;  %v591_v20 = vpop.f32.mrf.mxu0  ;;  %v3659_v23 = vld [vmem:[#allocation3 + $0x38] ss:$24 sps:$4 sm:$0xff]  }
 0x138   :  { %v4466_v6 = vpack.c.bf16 %v744_v42, %v741_v48  ;;  %v479_v40 = vadd.f32 %v5252_v9, %v4186_v39  ;;  %v683_v55 = vmax.f32 %v481_v18, 0.0  ;;  %v742_v11 = vmax.f32 %v664_v16, %v667_v62  ;;  %1927 = vmatpush1.bf16.msra.mxu1 %v3656_v14  ;;  %v3667_v48 = vld [vmem:[#allocation3 + $0xc] ss:$24 sps:$4 sm:$0xff]   ;;  %v3689_v42 = vld [vmem:[#allocation3 + $0x338] ss:$24 sps:$4 sm:$0xff]  }
 0x139   :  { %v764_v2 = vmax.f32 %v5249_v31, %v713_v47  ;;  %v767_v29 = vmax.f32 %v5251_v54, %v719_v8  ;;  %v745_v15 = vmax.f32 %v670_v26, %v673_v0  ;;  %v678_v60 = vmax.f32 %v588_v43, 0.0  ;;  %1928 = vmatprep.subr.bf16.mxu1 %v3661_v17  ;;  %v593_v62 = vpop.f32.mrf.mxu0  ;;  %v5253_v8 = vld [vmem:[#allocation13_spill] sm:$0xff] }
 0x13a   :  { %v592_v47 = vadd.f32 %v591_v20, %v4200_v45  ;;  %1752 = vmatprep.mubr.bf16.mxu1 %v4466_v6  ;;  %v4472_v25 = vpack.c.bf16 %v743_v52, %v740_v33  ;;  %v680_v27 = vmax.f32 %v4376_v61, 0.0  ;;  %v681_v18 = vmax.f32 %v4426_v37, 0.0  ;;  %2040 = vmatpush1.bf16.msra.mxu0 %v3680_v51  ;;  %v3700_v61 = vld [vmem:[#allocation3 + $0x30c] ss:$24 sps:$4 sm:$0xff]   ;;  %v3665_v51 = vld [vmem:[#allocation3 + $0x8] ss:$24 sps:$4 sm:$0xff]  }
 0x13b   :  { %v4474_v41 = vpack.c.bf16 %v767_v29, %v764_v2  ;;  %v677_v16 = vmax.f32 %v477_v30, 0.0  ;;  %v4478_v14 = vpack.c.bf16 %v745_v15, %v742_v11  ;;  %v4482_v43 = vadd.f32 %v5253_v8, %v4151_v24  ;;  %2041 = vmatprep.subr.bf16.mxu0 %v3691_v36  ;;  %v597_v50 = vpop.f32.mrf.mxu0  ;;  %v5255_v29 = vld [vmem:[#allocation14_spill] sm:$0xff] }
 0x13c   :  { %v679_v33 = vmax.f32 %v590_v10, 0.0  ;;  %v684_v52 = vmax.f32 %v592_v47, 0.0  ;;  %v594_v17 = vadd.f32 %v593_v62, %v4204_v46  ;;  %1753 = vmatmul.mubr.bf16.gmra.mxu1 %v4472_v25  ;;  %v676_v37 = vmax.f32 %v4457_v38, 0.0  ;;  %v3670_v38 = vld [vmem:[#allocation3 + $0x2dc] ss:$24 sps:$4 sm:$0xff]  }
 0x13d   :  { %v682_v26 = vmax.f32 %v479_v40, 0.0  ;;  %v749_v30 = vmax.f32 %v680_v27, %v683_v55  ;;  %v491_v0 = vadd.f32 %v4326_v53, %v4166_v32  ;;  %1866 = vmatmul.mubr.bf16.gmra.mxu0 %v4478_v14  ;;  %1929 = vmatpush1.bf16.msra.mxu1 %v3659_v23  ;;  %v5254_v63 = vmax.f32 %v4340_v44, 0.0  ;;  %v5256_v53 = vld [vmem:[#allocation16_spill] sm:$0xff]  ;;  %v599_v55 = vpop.f32.mrf.mxu0  ;;  %v3698_v11 = vld [vmem:[#allocation3 + $0x308] ss:$24 sps:$4 sm:$0xff]  }
 0x13e   :  { %v750_v2 = vmax.f32 %v681_v18, %v684_v52  ;;  %v685_v34 = vmax.f32 %v594_v17, 0.0  ;;  %v598_v54 = vadd.f32 %v597_v50, %v4200_v45  ;;  %1930 = vmatprep.subr.bf16.mxu1 %v3667_v48  ;;  %1875 = vmatprep.mubr.bf16.mxu0 %v5236_v22  ;;  %v376_v10 = vadd.f32 %v5255_v29, %v4142_v21  ;;  %v3709_v47 = vld [vmem:[#allocation3 + $0x464] ss:$24 sps:$4 sm:$0xff]   ;;  %v5258_v48 = vld [vmem:[#allocation12_spill] sm:$0xff] }
 0x13f   :  { %v747_v31 = vmax.f32 %v5254_v63, %v678_v60  ;;  %v378_v36 = vadd.f32 %v5256_v53, %v4151_v24  ;;  %v5257_v9 = vmax.f32 %v4321_v4, 0.0  ;;  %v487_v44 = vadd.f32 %v4295_v5, %v4166_v32  ;;  %2042 = vmatpush1.bf16.msra.mxu0 %v3689_v42  ;;  %v601_v18 = vpop.f32.mrf.mxu0  ;;  %v3679_v29 = vld [vmem:[#allocation3 + $0x27c] ss:$24 sps:$4 sm:$0xff]  }
 0x140   :  { %v748_v15 = vmax.f32 %v676_v37, %v679_v33  ;;  %v751_v20 = vmax.f32 %v682_v26, %v685_v34  ;;  %v600_v23 = vadd.f32 %v599_v55, %v4204_v46  ;;  %2043 = vmatprep.subr.bf16.mxu0 %v3700_v61  ;;  %v372_v27 = vadd.f32 %v5258_v48, %v4142_v21  ;;  %v3676_v21 = vld [vmem:[#allocation3 + $0x2ac] ss:$24 sps:$4 sm:$0xff]  }
 0x141   :  { %v746_v40 = vmax.f32 %v5257_v9, %v677_v16  ;;  %v4503_v60 = vpack.c.bf16 %v750_v2, %v747_v31  ;;  %v485_v4 = vadd.f32 %v4289_v56, %v4186_v39  ;;  %v489_v32 = vadd.f32 %v4306_v59, %v4186_v39  ;;  %1931 = vmatpush1.bf16.msra.mxu1 %v3665_v51  ;;  %v3668_v16 = vld [vmem:[#allocation3 + $0x2d8] ss:$24 sps:$4 sm:$0xff]   ;;  %v603_v59 = vpop.f32.mrf.mxu0  ;;  %v3674_v31 = vld [vmem:[#allocation3 + $0x2a8] ss:$24 sps:$4 sm:$0xff]  }
 0x142   :  { %v695_v5 = vmax.f32 %v491_v0, 0.0  ;;  %v690_v62 = vmax.f32 %v598_v54, 0.0  ;;  %v602_v42 = vadd.f32 %v601_v18, %v4200_v45  ;;  %1932 = vmatprep.subr.bf16.mxu1 %v3670_v38  ;;  %v4515_v33 = vpack.c.bf16 %v751_v20, %v748_v15 }
 0x143   :  { %1762 = vmatprep.mubr.bf16.mxu1 %v4503_v60  ;;  %v4513_v8 = vpack.c.bf16 %v749_v30, %v746_v40  ;;  %v687_v56 = vmax.f32 %v4482_v43, 0.0  ;;  %v692_v52 = vmax.f32 %v376_v10, 0.0  ;;  %v689_v17 = vmax.f32 %v487_v44, 0.0  ;;  %2044 = vmatpush1.bf16.msra.mxu0 %v3698_v11  ;;  %v607_v43 = vpop.f32.mrf.mxu0  ;;  %v5259_v10 = vld [vmem:[#allocation6_spill] sm:$0xff] }
 0x144   :  { %v693_v61 = vmax.f32 %v378_v36, 0.0  ;;  %v691_v37 = vmax.f32 %v600_v23, 0.0  ;;  %v696_v26 = vmax.f32 %v602_v42, 0.0  ;;  %v604_v0 = vadd.f32 %v603_v59, %v4204_v46  ;;  %2255 = vmatprep.subr.bf16.mxu0 %v3709_v47  ;;  %v5260_v36 = vld [vmem:[#allocation7_spill] sm:$0xff] }
 0x145   :  { %1763 = vmatmul.mubr.bf16.gmra.mxu1 %v4513_v8  ;;  %v686_v30 = vmax.f32 %v372_v27, 0.0  ;;  %v688_v50 = vmax.f32 %v485_v4, 0.0  ;;  %v694_v51 = vmax.f32 %v489_v32, 0.0  ;;  %v755_v63 = vmax.f32 %v692_v52, %v695_v5  ;;  %1876 = vmatmul.mubr.bf16.gmra.mxu0 %v4515_v33  ;;  %v609_v44 = vpop.f32.mrf.mxu0  ;;  %v3677_v27 = vld [vmem:[#allocation3 + $0x278] ss:$24 sps:$4 sm:$0xff]  }
 0x146   :  { %1933 = vmatpush2.bf16.msra.mxu1 %v3668_v16  ;;  %v753_v2 = vmax.f32 %v687_v56, %v690_v62  ;;  %v756_v34 = vmax.f32 %v693_v61, %v696_v26  ;;  %v697_v54 = vmax.f32 %v604_v0, 0.0  ;;  %v608_v38 = vadd.f32 %v607_v43, %v4200_v45  ;;  %1885 = vmatprep.mubr.bf16.mxu0 %v5236_v22  ;;  %v3685_v16 = vld [vmem:[#allocation3 + $0x24c] ss:$24 sps:$4 sm:$0xff]   ;;  %v3683_v61 = vld [vmem:[#allocation3 + $0x248] ss:$24 sps:$4 sm:$0xff]   ;;  %v5262_v43 = vld [vmem:[#allocation9_spill] sm:$0xff] }
 0x147   :  { %1934 = vmatprep.subr.bf16.mxu1 %v3676_v21  ;;  %v384_v53 = vadd.f32 %v5259_v10, %v4151_v24  ;;  %v388_v9 = vadd.f32 %v5260_v36, %v4151_v24  ;;  %v752_v40 = vmax.f32 %v686_v30, %v689_v17  ;;  %v754_v55 = vmax.f32 %v688_v50, %v691_v37  ;;  %v611_v48 = vpop.f32.mrf.mxu0  ;;  %v3688_v50 = vld [vmem:[#allocation3 + $0x21c] ss:$24 sps:$4 sm:$0xff]   ;;  %v3686_v36 = vld [vmem:[#allocation3 + $0x218] ss:$24 sps:$4 sm:$0xff]  }
 0x148   :  { %v757_v11 = vmax.f32 %v694_v51, %v697_v54  ;;  %v610_v15 = vadd.f32 %v609_v44, %v4204_v46  ;;  %v4528_v20 = vpack.c.bf16 %v756_v34, %v753_v2  ;;  %v495_v23 = vadd.f32 %v4344_v12, %v4186_v39  ;;  %v5261_v51 = vld [vmem:[#allocation8_spill] sm:$0xff] }
 0x149   :  { %v499_v47 = vadd.f32 %v4366_v1, %v4186_v39  ;;  %v702_v4 = vmax.f32 %v608_v38, 0.0  ;;  %v612_v32 = vadd.f32 %v611_v48, %v4200_v45  ;;  %v4536_v5 = vpack.c.bf16 %v755_v63, %v752_v40  ;;  %v613_v42 = vpop.f32.mrf.mxu0 }
 0x14a   :  { %1935 = vmatpush2.bf16.msra.mxu1 %v3674_v31  ;;  %1772 = vmatprep.mubr.bf16.mxu1 %v4528_v20  ;;  %v4538_v18 = vpack.c.bf16 %v757_v11, %v754_v55  ;;  %v699_v62 = vmax.f32 %v384_v53, 0.0  ;;  %v705_v12 = vmax.f32 %v388_v9, 0.0  ;;  %v703_v21 = vmax.f32 %v610_v15, 0.0  ;;  %v3694_v55 = vld [vmem:[#allocation3 + $0x1ec] ss:$24 sps:$4 sm:$0xff]  }
 0x14b   :  { %1936 = vmatprep.subr.bf16.mxu1 %v3679_v29  ;;  %v708_v56 = vmax.f32 %v612_v32, 0.0  ;;  %v614_v1 = vadd.f32 %v613_v42, %v4204_v46  ;;  %v700_v52 = vmax.f32 %v495_v23, 0.0  ;;  %v706_v17 = vmax.f32 %v499_v47, 0.0  ;;  %v617_v59 = vpop.f32.mrf.mxu0 }
 0x14c   :  { %v759_v37 = vmax.f32 %v699_v62, %v702_v4  ;;  %v618_v30 = vadd.f32 %v617_v59, %v4200_v45  ;;  %v394_v63 = vadd.f32 %v5261_v51, %v4151_v24  ;;  %v398_v31 = vadd.f32 %v5262_v43, %v4151_v24  ;;  %v3704_v59 = vld [vmem:[#allocation3 + $0x160] ss:$24 sps:$4 sm:$0xff]   ;;  %v3716_v51 = vld [vmem:[#allocation3 + $0x430] ss:$24 sps:$4 sm:$0xff]   ;;  %v3727_v43 = vld [vmem:[#allocation3 + $0x404] ss:$24 sps:$4 sm:$0xff]  }
 0x14d   :  { %1773 = vmatmul.mubr.bf16.gmra.mxu1 %v4536_v5  ;;  %1886 = vmatmul.mubr.bf16.gmra.mxu0 %v4538_v18  ;;  %v762_v26 = vmax.f32 %v705_v12, %v708_v56  ;;  %v709_v0 = vmax.f32 %v614_v1, 0.0  ;;  %v619_v2 = vpop.f32.mrf.mxu0  ;;  %v760_v34 = vmax.f32 %v700_v52, %v703_v21  ;;  %v505_v10 = vadd.f32 %v4396_v49, %v4186_v39  ;;  %v3703_v56 = vld [vmem:[#allocation3 + $0x18c] ss:$24 sps:$4 sm:$0xff]   ;;  %v3701_v1 = vld [vmem:[#allocation3 + $0x188] ss:$24 sps:$4 sm:$0xff]  }
 0x14e   :  { %1937 = vmatpush2.bf16.msra.mxu1 %v3677_v27  ;;  %1895 = vmatprep.mubr.bf16.mxu0 %v5236_v22  ;;  %v620_v38 = vadd.f32 %v619_v2, %v4204_v46  ;;  %v509_v9 = vadd.f32 %v4420_v3, %v4186_v39  ;;  %v714_v40 = vmax.f32 %v618_v30, 0.0  ;;  %v711_v11 = vmax.f32 %v394_v63, 0.0  ;;  %v3692_v39 = vld [vmem:[#allocation3 + $0x1e8] ss:$24 sps:$4 sm:$0xff]   ;;  %v5265_v30 = vld [vmem:[#allocation21_spill] sm:$0xff] }
 0x14f   :  { %1938 = vmatprep.subr.bf16.mxu1 %v3685_v16  ;;  %v763_v54 = vmax.f32 %v706_v17, %v709_v0  ;;  %v4550_v29 = vpack.c.bf16 %v762_v26, %v759_v37  ;;  %v621_v53 = vpop.f32.mrf.mxu0  ;;  %v717_v23 = vmax.f32 %v398_v31, 0.0  ;;  %v712_v27 = vmax.f32 %v505_v10, 0.0  ;;  %v3697_v16 = vld [vmem:[#allocation3 + $0x1bc] ss:$24 sps:$4 sm:$0xff]   ;;  %v5263_v52 = vld [vmem:[#allocation19_spill] sm:$0xff] }
 0x150   :  { %v622_v44 = vadd.f32 %v621_v53, %v4200_v45  ;;  %v715_v47 = vmax.f32 %v620_v38, 0.0  ;;  %v718_v45 = vmax.f32 %v509_v9, 0.0  ;;  %v765_v3 = vmax.f32 %v711_v11, %v714_v40  ;;  %v3706_v17 = vld [vmem:[#allocation3 + $0x164] ss:$24 sps:$4 sm:$0xff]   ;;  %v3712_v37 = vld [vmem:[#allocation3 + $0x134] ss:$24 sps:$4 sm:$0xff]  }
 0x151   :  { %1782 = vmatprep.mubr.bf16.mxu1 %v4550_v29  ;;  %v4558_v24 = vpack.c.bf16 %v763_v54, %v760_v34  ;;  %v623_v15 = vpop.f32.mrf.mxu0  ;;  %v5264_v26 = vld [vmem:[#allocation20_spill] sm:$0xff]  ;;  %v3715_v63 = vld [vmem:[#allocation3 + $0x104] ss:$24 sps:$4 sm:$0xff]   ;;  %v3713_v31 = vld [vmem:[#allocation3 + $0x100] ss:$24 sps:$4 sm:$0xff]  }
 0x152   :  { %1939 = vmatpush2.bf16.msra.mxu1 %v3683_v61  ;;  %v720_v49 = vmax.f32 %v622_v44, 0.0  ;;  %v624_v48 = vadd.f32 %v623_v15, %v4204_v46  ;;  %v766_v62 = vmax.f32 %v712_v27, %v715_v47  ;;  %v3695_v46 = vld [vmem:[#allocation3 + $0x1b8] ss:$24 sps:$4 sm:$0xff]   ;;  %v3718_v0 = vld [vmem:[#allocation3 + $0x434] ss:$24 sps:$4 sm:$0xff]  }
 0x153   :  { %1940 = vmatprep.subr.bf16.mxu1 %v3688_v50  ;;  %v3707_v61 = vld [vmem:[#allocation3 + $0x460] ss:$24 sps:$4 sm:$0xff]   ;;  %v3710_v50 = vld [vmem:[#allocation3 + $0x130] ss:$24 sps:$4 sm:$0xff]   ;;  %v3721_v2 = vld [vmem:[#allocation3 + $0xd4] ss:$24 sps:$4 sm:$0xff]  }
 0x154   :  { %v768_v4 = vmax.f32 %v717_v23, %v720_v49  ;;  %v721_v32 = vmax.f32 %v624_v48, 0.0  ;;  %v3725_v34 = vld [vmem:[#allocation3 + $0x400] ss:$24 sps:$4 sm:$0xff]   ;;  %v3736_v54 = vld [vmem:[#allocation3 + $0x3d4] ss:$24 sps:$4 sm:$0xff]  }
 0x155   :  { %1783 = vmatmul.mubr.bf16.gmra.mxu1 %v4437_v7  ;;  %1896 = vmatmul.mubr.bf16.gmra.mxu0 %v4558_v24  ;;  %v3719_v38 = vld [vmem:[#allocation3 + $0xd0] ss:$24 sps:$4 sm:$0xff]   ;;  %v3724_v10 = vld [vmem:[#allocation3 + $0xa4] ss:$24 sps:$4 sm:$0xff]   ;;  %v3722_v9 = vld [vmem:[#allocation3 + $0xa0] ss:$24 sps:$4 sm:$0xff]  }
 0x156   :  { %1941 = vmatpush2.bf16.msra.mxu1 %v3686_v36  ;;  %1905 = vmatprep.mubr.bf16.mxu0 %v5236_v22  ;;  %v769_v42 = vmax.f32 %v718_v45, %v721_v32  ;;  %v4564_v12 = vpack.c.bf16 %v768_v4, %v765_v3  ;;  %v3734_v53 = vld [vmem:[#allocation3 + $0x3d0] ss:$24 sps:$4 sm:$0xff]   ;;  %v3745_v36 = vld [vmem:[#allocation3 + $0x3a4] ss:$24 sps:$4 sm:$0xff]   ;;  %v3730_v40 = vld [vmem:[#allocation3 + $0x74] ss:$24 sps:$4 sm:$0xff]  }
 0x157   :  { %1942 = vmatprep.subr.bf16.mxu1 %v3694_v55  ;;  %v3743_v44 = vld [vmem:[#allocation3 + $0x3a0] ss:$24 sps:$4 sm:$0xff]   ;;  %v3754_v55 = vld [vmem:[#allocation3 + $0x374] ss:$24 sps:$4 sm:$0xff]   ;;  %v3728_v11 = vld [vmem:[#allocation3 + $0x70] ss:$24 sps:$4 sm:$0xff]  }
 0x158   :  { %1792 = vmatprep.mubr.bf16.mxu1 %v4564_v12  ;;  %v4567_v21 = vpack.c.bf16 %v769_v42, %v766_v62  ;;  %v3733_v15 = vld [vmem:[#allocation3 + $0x44] ss:$24 sps:$4 sm:$0xff]   ;;  %v3752_v23 = vld [vmem:[#allocation3 + $0x370] ss:$24 sps:$4 sm:$0xff]   ;;  %v3731_v49 = vld [vmem:[#allocation3 + $0x40] ss:$24 sps:$4 sm:$0xff]  }
 0x159   :  { %v3763_v47 = vld [vmem:[#allocation3 + $0x344] ss:$24 sps:$4 sm:$0xff]   ;;  %v3739_v48 = vld [vmem:[#allocation3 + $0x14] ss:$24 sps:$4 sm:$0xff]   ;;  %v3761_v27 = vld [vmem:[#allocation3 + $0x340] ss:$24 sps:$4 sm:$0xff]  }
 0x15a   :  { %1943 = vmatpush2.bf16.msra.mxu1 %v3692_v39  ;;  %v3772_v39 = vld [vmem:[#allocation3 + $0x314] ss:$24 sps:$4 sm:$0xff]   ;;  %v3737_v45 = vld [vmem:[#allocation3 + $0x10] ss:$24 sps:$4 sm:$0xff]   ;;  %v3742_v3 = vld [vmem:[#allocation3 + $0x2e4] ss:$24 sps:$4 sm:$0xff]  }
 0x15b   :  { %1944 = vmatprep.subr.bf16.mxu1 %v3697_v16  ;;  %v3770_v4 = vld [vmem:[#allocation3 + $0x310] ss:$24 sps:$4 sm:$0xff]   ;;  %v3740_v32 = vld [vmem:[#allocation3 + $0x2e0] ss:$24 sps:$4 sm:$0xff]   ;;  %v3748_v16 = vld [vmem:[#allocation3 + $0x2b4] ss:$24 sps:$4 sm:$0xff]  }
 0x15c   :  { %v3746_v62 = vld [vmem:[#allocation3 + $0x2b0] ss:$24 sps:$4 sm:$0xff]   ;;  %v3751_v42 = vld [vmem:[#allocation3 + $0x284] ss:$24 sps:$4 sm:$0xff]  }
 0x15d   :  { %1793 = vmatmul.mubr.bf16.gmra.mxu1 %v4474_v41  ;;  %1906 = vmatmul.mubr.bf16.gmra.mxu0 %v4567_v21 }
 0x15e   :  { %1945 = vmatpush2.bf16.msra.mxu1 %v3695_v46  ;;  %1948 = vmatprep.mubr.bf16.mxu1 %v5263_v52  ;;  %v3749_v46 = vld [vmem:[#allocation3 + $0x280] ss:$24 sps:$4 sm:$0xff]  }
 0x15f   :  { %1946 = vmatprep.subr.bf16.mxu1 %v3703_v56  ;;  %2061 = vmatprep.mubr.bf16.mxu0 %v5236_v22  ;;  %v3757_v56 = vld [vmem:[#allocation3 + $0x254] ss:$24 sps:$4 sm:$0xff]  }
 0x162   :  { %1947 = vmatpush2.bf16.msra.mxu1 %v3701_v1  ;;  %v3755_v1 = vld [vmem:[#allocation3 + $0x250] ss:$24 sps:$4 sm:$0xff]  }
 0x163   :  { %2142 = vmatprep.subr.bf16.mxu1 %v3706_v17  ;;  %v3760_v17 = vld [vmem:[#allocation3 + $0x224] ss:$24 sps:$4 sm:$0xff]  }
 0x165   :  { %1949 = vmatmul.mubr.bf16.vlgmr.msra.gmra.mxu1 %v5264_v26  ;;  %2062 = vmatmul.mubr.bf16.vlgmr.msra.gmra.mxu0 %v5265_v30 }
 0x166   :  { %1958 = vmatprep.mubr.bf16.mxu1 %v4368_v58  ;;  %2143 = vmatpush1.bf16.msra.mxu1 %v3704_v59  ;;  %v3758_v59 = vld [vmem:[#allocation3 + $0x220] ss:$24 sps:$4 sm:$0xff]  }
 0x167   :  { %2256 = vmatpush1.bf16.msra.mxu0 %v3707_v61  ;;  %2144 = vmatprep.subr.bf16.mxu1 %v3712_v37  ;;  %v3766_v61 = vld [vmem:[#allocation3 + $0x1f4] ss:$24 sps:$4 sm:$0xff]   ;;  %v3764_v37 = vld [vmem:[#allocation3 + $0x1f0] ss:$24 sps:$4 sm:$0xff]  }
 0x168   :  { %2071 = vmatprep.mubr.bf16.mxu0 %v5236_v22  ;;  %2257 = vmatprep.subr.bf16.mxu0 %v3718_v0  ;;  %v3769_v0 = vld [vmem:[#allocation3 + $0x1c4] ss:$24 sps:$4 sm:$0xff]  }
 0x16a   :  { %2145 = vmatpush1.bf16.msra.mxu1 %v3710_v50  ;;  %v3767_v50 = vld [vmem:[#allocation3 + $0x1c0] ss:$24 sps:$4 sm:$0xff]  }
 0x16b   :  { %2258 = vmatpush1.bf16.msra.mxu0 %v3716_v51  ;;  %2146 = vmatprep.subr.bf16.mxu1 %v3715_v63  ;;  %v3775_v51 = vld [vmem:[#allocation3 + $0x194] ss:$24 sps:$4 sm:$0xff]   ;;  %v3773_v63 = vld [vmem:[#allocation3 + $0x190] ss:$24 sps:$4 sm:$0xff]  }
 0x16c   :  { %2259 = vmatprep.subr.bf16.mxu0 %v3727_v43 }
 0x16d   :  { %1959 = vmatmul.mubr.bf16.gmra.mxu1 %v4372_v19  ;;  %2072 = vmatmul.mubr.bf16.gmra.mxu0 %v4383_v28 }
 0x16e   :  { %1968 = vmatprep.mubr.bf16.mxu1 %v4422_v13  ;;  %2147 = vmatpush1.bf16.msra.mxu1 %v3713_v31 }
 0x16f   :  { %2081 = vmatprep.mubr.bf16.mxu0 %v5236_v22  ;;  %2148 = vmatprep.subr.bf16.mxu1 %v3721_v2 }
 0x170   :  { %2260 = vmatpush1.bf16.msra.mxu0 %v3725_v34 }
 0x171   :  { %2261 = vmatprep.subr.bf16.mxu0 %v3736_v54 }
 0x172   :  { %2149 = vmatpush1.bf16.msra.mxu1 %v3719_v38 }
 0x173   :  { %2150 = vmatprep.subr.bf16.mxu1 %v3724_v10 }
 0x174   :  { %2262 = vmatpush1.bf16.msra.mxu0 %v3734_v53 }
 0x175   :  { %1969 = vmatmul.mubr.bf16.gmra.mxu1 %v4429_v35  ;;  %2263 = vmatprep.subr.bf16.mxu0 %v3745_v36 }
 0x176   :  { %1978 = vmatprep.mubr.bf16.mxu1 %v4466_v6  ;;  %2082 = vmatmul.mubr.bf16.gmra.mxu0 %v4435_v57 }
 0x177   :  { %2151 = vmatpush1.bf16.msra.mxu1 %v3722_v9  ;;  %2091 = vmatprep.mubr.bf16.mxu0 %v5236_v22 }
 0x178   :  { %2152 = vmatprep.subr.bf16.mxu1 %v3730_v40  ;;  %2264 = vmatpush1.bf16.msra.mxu0 %v3743_v44  ;;  %v3793_v44 = vld [vmem:[%s5186_s5 + $0x48] sm:$0xff]  }
 0x179   :  { %2265 = vmatprep.subr.bf16.mxu0 %v3754_v55 }
 0x17b   :  { %2153 = vmatpush1.bf16.msra.mxu1 %v3728_v11  ;;  %v3792_v11 = vld [vmem:[%s5186_s5 + $0x98] sm:$0xff]  }
 0x17c   :  { %2154 = vmatprep.subr.bf16.mxu1 %v3733_v15  ;;  %2266 = vmatpush1.bf16.msra.mxu0 %v3752_v23  ;;  %v3794_v15 = vld [vmem:[%s5186_s5 + $0x8] sm:$0xff]  }
 0x17d   :  { %1979 = vmatmul.mubr.bf16.gmra.mxu1 %v4472_v25  ;;  %2267 = vmatprep.subr.bf16.mxu0 %v3763_v47 }
 0x17e   :  { %1988 = vmatprep.mubr.bf16.mxu1 %v4503_v60  ;;  %2092 = vmatmul.mubr.bf16.gmra.mxu0 %v4478_v14 }
 0x17f   :  { %2155 = vmatpush1.bf16.msra.mxu1 %v3731_v49  ;;  %2101 = vmatprep.mubr.bf16.mxu0 %v5236_v22 }
 0x180   :  { %2156 = vmatprep.subr.bf16.mxu1 %v3739_v48  ;;  %2268 = vmatpush1.bf16.msra.mxu0 %v3761_v27 }
 0x181   :  { %2269 = vmatprep.subr.bf16.mxu0 %v3772_v39 }
 0x183   :  { %2157 = vmatpush1.bf16.msra.mxu1 %v3737_v45  ;;  %v3796_v45 = vld [vmem:[%s5186_s5 + $0x40] sm:$0xff]  }
 0x184   :  { %2158 = vmatprep.subr.bf16.mxu1 %v3742_v3  ;;  %2270 = vmatpush1.bf16.msra.mxu0 %v3770_v4  ;;  %v3795_v4 = vld [vmem:[%s5186_s5 + $0x90] sm:$0xff]  }
 0x185   :  { %1989 = vmatmul.mubr.bf16.gmra.mxu1 %v4513_v8 }
 0x186   :  { %1998 = vmatprep.mubr.bf16.mxu1 %v4528_v20  ;;  %2102 = vmatmul.mubr.bf16.gmra.mxu0 %v4515_v33 }
 0x187   :  { %2159 = vmatpush2.bf16.msra.mxu1 %v3740_v32  ;;  %2111 = vmatprep.mubr.bf16.mxu0 %v5236_v22  ;;  %v3797_v32 = vld [vmem:[%s5186_s5] sm:$0xff]  }
 0x188   :  { %2160 = vmatprep.subr.bf16.mxu1 %v3748_v16 }
 0x18b   :  { %2161 = vmatpush2.bf16.msra.mxu1 %v3746_v62 }
 0x18c   :  { %2162 = vmatprep.subr.bf16.mxu1 %v3751_v42 }
 0x18d   :  { %1999 = vmatmul.mubr.bf16.gmra.mxu1 %v4536_v5 }
 0x18e   :  { %2008 = vmatprep.mubr.bf16.mxu1 %v4550_v29  ;;  %2112 = vmatmul.mubr.bf16.gmra.mxu0 %v4538_v18 }
 0x18f   :  { %2163 = vmatpush2.bf16.msra.mxu1 %v3749_v46  ;;  %2121 = vmatprep.mubr.bf16.mxu0 %v5236_v22 }
 0x190   :  { %2164 = vmatprep.subr.bf16.mxu1 %v3757_v56 }
 0x193   :  { %2165 = vmatpush2.bf16.msra.mxu1 %v3755_v1 }
 0x194   :  { %2166 = vmatprep.subr.bf16.mxu1 %v3760_v17 }
 0x195   :  { %2009 = vmatmul.mubr.bf16.gmra.mxu1 %v4437_v7 }
 0x196   :  { %2018 = vmatprep.mubr.bf16.mxu1 %v4564_v12  ;;  %2122 = vmatmul.mubr.bf16.gmra.mxu0 %v4558_v24 }
 0x197   :  { %2167 = vmatpush2.bf16.msra.mxu1 %v3758_v59  ;;  %2131 = vmatprep.mubr.bf16.mxu0 %v5236_v22 }
 0x198   :  { %2168 = vmatprep.subr.bf16.mxu1 %v3766_v61 }
 0x19b   :  { %2169 = vmatpush2.bf16.msra.mxu1 %v3764_v37  ;;  %v3798_v37 = vld [vmem:[%s5186_s5 + $0x88] sm:$0xff]  }
 0x19c   :  { %2170 = vmatprep.subr.bf16.mxu1 %v3769_v0 }
 0x19d   :  { %2019 = vmatmul.mubr.bf16.gmra.mxu1 %v4474_v41 }
 0x19e   :  { %2132 = vmatmul.mubr.bf16.gmra.mxu0 %v4567_v21  ;;  %2174 = vmatprep.mubr.bf16.mxu1 %v5263_v52 }
 0x19f   :  { %2171 = vmatpush2.bf16.msra.mxu1 %v3767_v50  ;;  %2287 = vmatprep.mubr.bf16.mxu0 %v5236_v22 }
 0x1a0   :  { %2172 = vmatprep.subr.bf16.mxu1 %v3775_v51 }
 0x1a3   :  { %2173 = vmatpush2.bf16.msra.mxu1 %v3773_v63 }
 0x1a6   :  { %2175 = vmatmul.mubr.bf16.vlgmr.msra.gmra.mxu1 %v5264_v26  ;;  %2288 = vmatmul.mubr.bf16.vlgmr.msra.gmra.mxu0 %v5265_v30  ;;  %v3790_v26 = vld [vmem:[%s5186_s5 + $0x50] sm:$0xff]  }
 0x1a7   :  { %2184 = vmatprep.mubr.bf16.mxu1 %v4368_v58  ;;  %2297 = vmatprep.mubr.bf16.mxu0 %v5236_v22  ;;  %v3776_v58 = vld [vmem:[%s5186_s5 + $0x78] sm:$0xff]   ;;  %v3791_v30 = vld [vmem:[%s5186_s5 + $0x10] sm:$0xff]  }
 0x1a8   :  { %3398 = vmatprep.subr.bf16.mxu1 %v3776_v58 }
 0x1ae   :  { %2185 = vmatmul.mubr.bf16.gmra.mxu1 %v4372_v19  ;;  %2298 = vmatmul.mubr.bf16.gmra.mxu0 %v4383_v28  ;;  %v3778_v19 = vld [vmem:[%s5186_s5 + $0x70] sm:$0xff]  }
 0x1af   :  { %2194 = vmatprep.mubr.bf16.mxu1 %v4422_v13  ;;  %2307 = vmatprep.mubr.bf16.mxu0 %v5236_v22  ;;  %v3777_v13 = vld [vmem:[%s5186_s5 + $0x38] sm:$0xff]   ;;  %v3779_v28 = vld [vmem:[%s5186_s5 + $0x30] sm:$0xff]  }
 0x1b0   :  { %3399 = vmatpush3.bf16.msra.mxu1 %v3777_v13 }
 0x1b1   :  { %3400 = vmatprep.subr.bf16.mxu1 %v3778_v19 }
 0x1b4   :  { %3401 = vmatpush3.bf16.msra.mxu1 %v3779_v28 }
 0x1b6   :  { %2195 = vmatmul.mubr.bf16.gmra.mxu1 %v4429_v35  ;;  %2308 = vmatmul.mubr.bf16.gmra.mxu0 %v4435_v57  ;;  %v3780_v35 = vld [vmem:[%s5186_s5 + $0xb8] sm:$0xff]   ;;  %v3781_v57 = vld [vmem:[%s5186_s5 + $0x68] sm:$0xff]  }
 0x1b7   :  { %2204 = vmatprep.mubr.bf16.mxu1 %v4466_v6  ;;  %2317 = vmatprep.mubr.bf16.mxu0 %v5236_v22  ;;  %v3782_v6 = vld [vmem:[%s5186_s5 + $0x28] sm:$0xff]  }
 0x1b8   :  { %3478 = vmatprep.subr.bf16.mxu0 %v3780_v35  ;;  %3402 = vmatprep.subr.bf16.mxu1 %v3781_v57 }
 0x1b9   :  { %3479 = vmatpush3.bf16.msra.mxu0 %v3780_v35  ;;  %3403 = vmatpush3.bf16.msra.mxu1 %v3782_v6  ;;  %v3799_v35 = vld [vmem:[%s5186_s5 + $0x80] sm:$0xff]  }
 0x1be   :  { %2205 = vmatmul.mubr.bf16.gmra.mxu1 %v4472_v25  ;;  %2318 = vmatmul.mubr.bf16.gmra.mxu0 %v4478_v14  ;;  %v3783_v25 = vld [vmem:[%s5186_s5 + $0xb0] sm:$0xff]   ;;  %v3784_v14 = vld [vmem:[%s5186_s5 + $0x60] sm:$0xff]  }
 0x1bf   :  { %2214 = vmatprep.mubr.bf16.mxu1 %v4503_v60  ;;  %2327 = vmatprep.mubr.bf16.mxu0 %v5236_v22  ;;  %v3785_v60 = vld [vmem:[%s5186_s5 + $0x20] sm:$0xff]  }
 0x1c0   :  { %3480 = vmatprep.subr.bf16.mxu0 %v3783_v25  ;;  %3404 = vmatprep.subr.bf16.mxu1 %v3784_v14 }
 0x1c1   :  { %3481 = vmatpush3.bf16.msra.mxu0 %v3783_v25  ;;  %3405 = vmatpush3.bf16.msra.mxu1 %v3785_v60 }
 0x1c6   :  { %2215 = vmatmul.mubr.bf16.gmra.mxu1 %v4513_v8  ;;  %2328 = vmatmul.mubr.bf16.gmra.mxu0 %v4515_v33  ;;  %v3787_v8 = vld [vmem:[%s5186_s5 + $0x58] sm:$0xff]   ;;  %v4677_v33 = vld [vmem:[%s5185_s4] sm:$0x3f] }
 0x1c7   :  { %2224 = vmatprep.mubr.bf16.mxu1 %v4528_v20  ;;  %2337 = vmatprep.mubr.bf16.mxu0 %v5236_v22 }
 0x1c8   :  { %3406 = vmatprep.subr.bf16.mxu1 %v3787_v8 }
 0x1ce   :  { %2225 = vmatmul.mubr.bf16.gmra.mxu1 %v4536_v5  ;;  %2338 = vmatmul.mubr.bf16.gmra.mxu0 %v4538_v18  ;;  %v5267_v5 = vld [vmem:[#allocation10_spill] sm:$0xff] }
 0x1cf   :  { %2234 = vmatprep.mubr.bf16.mxu1 %v4550_v29  ;;  %2347 = vmatprep.mubr.bf16.mxu0 %v5236_v22  ;;  %v5268_v18 = vsub.s32 1, %v5267_v5 }
 0x1d1   :  { %v4686_v29 = vrot.slane %v4677_v33, %v5268_v18 }
 0x1d6   :  { %2235 = vmatmul.mubr.bf16.gmra.mxu1 %v4437_v7  ;;  %2348 = vmatmul.mubr.bf16.gmra.mxu0 %v4558_v24  ;;  %v3786_v7 = vld [vmem:[%s5186_s5 + $0xa8] sm:$0xff]   ;;  %v3789_v24 = vld [vmem:[%s5186_s5 + $0xa0] sm:$0xff]  }
 0x1d7   :  { %2244 = vmatprep.mubr.bf16.mxu1 %v4564_v12  ;;  %2357 = vmatprep.mubr.bf16.mxu0 %v5236_v22  ;;  %v3788_v22 = vld [vmem:[%s5186_s5 + $0x18] sm:$0xff]  }
 0x1d8   :  { %3482 = vmatprep.subr.bf16.mxu0 %v3786_v7  ;;  %3407 = vmatpush3.bf16.msra.mxu1 %v3788_v22 }
 0x1d9   :  { %3483 = vmatpush3.bf16.msra.mxu0 %v3786_v7  ;;  %3408 = vmatprep.subr.bf16.mxu1 %v3790_v26 }
 0x1da   :  { %3484 = vmatprep.subr.bf16.mxu0 %v3789_v24 }
 0x1dc   :  { %3409 = vmatpush3.bf16.msra.mxu1 %v3791_v30 }
 0x1dd   :  { %3485 = vmatpush3.bf16.msra.mxu0 %v3789_v24  ;;  %3410 = vmatprep.subr.bf16.mxu1 %v3793_v44 }
 0x1de   :  { %2245 = vmatmul.mubr.bf16.gmra.mxu1 %v4474_v41  ;;  %2358 = vmatmul.mubr.bf16.gmra.mxu0 %v4567_v21  ;;  %v5266_v41 = vld [vmem:[#allocation11_spill] sm:$0xff] }
 0x1df   :  { %v4681_v20 = vrot.slane %v4677_v33, %v5266_v41  ;;  %3486 = vmatprep.subr.bf16.mxu0 %v3792_v11 }
 0x1e0   :  { %3411 = vmatpush3.bf16.msra.mxu1 %v3794_v15 }
 0x1e1   :  { %v1724_v12 = vpop.f32.mrf.mxu1  ;;  %3487 = vmatpush3.bf16.msra.mxu0 %v3792_v11  ;;  %3412 = vmatprep.subr.bf16.mxu1 %v3796_v45 }
 0x1e2   :  { %v1725_v21 = vadd.f32 %v1724_v12, %v4681_v20  ;;  %v1837_v52 = vpop.f32.mrf.mxu0  ;;  %3488 = vmatprep.subr.bf16.mxu0 %v3795_v4 }
 0x1e3   :  { %v1726_v43 = vpop.f32.mrf.mxu1 }
 0x1e4   :  { %v4698_v31 = vadd.f32 %v1837_v52, %v1725_v21  ;;  %v1727_v2 = vadd.f32 %v1726_v43, %v4686_v29  ;;  %v1839_v34 = vpop.f32.mrf.mxu0  ;;  %3413 = vmatpush3.bf16.msra.mxu1 %v3797_v32 }
 0x1e5   :  { %v1728_v54 = vpop.f32.mrf.mxu1  ;;  %3489 = vmatpush3.bf16.msra.mxu0 %v3795_v4 }
 0x1e6   :  { %v4701_v38 = vadd.f32 %v1839_v34, %v1727_v2  ;;  %v1729_v10 = vadd.f32 %v1728_v54, %v4681_v20  ;;  %v1841_v53 = vpop.f32.mrf.mxu0  ;;  %3490 = vmatprep.subr.bf16.mxu0 %v3798_v37 }
 0x1e7   :  { %v4704_v36 = vpop.f32.mrf.mxu1 }
 0x1e8   :  { %v4706_v9 = vadd.f32 %v1841_v53, %v1729_v10  ;;  %v4708_v40 = vpop.f32.mrf.mxu0 }
 0x1e9   :  { %3491 = vmatpush3.bf16.msra.mxu0 %v3798_v37 }
 0x1ea   :  { %v1734_v55 = vpop.f32.mrf.mxu1  ;;  %v1847_v47 = vpop.f32.mrf.mxu0  ;;  %3492 = vmatprep.subr.bf16.mxu0 %v3799_v35 }
 0x1eb   :  { %v1735_v23 = vadd.f32 %v1734_v55, %v4681_v20 }
 0x1ec   :  { %v1736_v49 = vpop.f32.mrf.mxu1  ;;  %v1849_v39 = vpop.f32.mrf.mxu0 }
 0x1ed   :  { %v4720_v48 = vadd.f32 %v1847_v47, %v1735_v23  ;;  %v1737_v27 = vadd.f32 %v1736_v49, %v4686_v29  ;;  %3493 = vmatpush3.bf16.msra.mxu0 %v3799_v35 }
 0x1ee   :  { %v1738_v3 = vpop.f32.mrf.mxu1  ;;  %v1851_v42 = vpop.f32.mrf.mxu0 }
 0x1ef   :  { %v4732_v16 = vadd.f32 %v1849_v39, %v1737_v27  ;;  %v1739_v62 = vadd.f32 %v1738_v3, %v4681_v20 }
 0x1f0   :  { %v4735_v46 = vpop.f32.mrf.mxu1  ;;  %v4739_v1 = vpop.f32.mrf.mxu0 }
 0x1f1   :  { %v4737_v56 = vadd.f32 %v1851_v42, %v1739_v62 }
 0x1f3   :  { %v1744_v17 = vpop.f32.mrf.mxu1 }
 0x1f4   :  { %v1745_v59 = vadd.f32 %v1744_v17, %v4681_v20  ;;  %v1857_v61 = vpop.f32.mrf.mxu0 }
 0x1f5   :  { %v1746_v0 = vpop.f32.mrf.mxu1 }
 0x1f6   :  { %v4745_v50 = vadd.f32 %v1857_v61, %v1745_v59  ;;  %v1747_v51 = vadd.f32 %v1746_v0, %v4686_v29  ;;  %v1859_v63 = vpop.f32.mrf.mxu0 }
 0x1f7   :  { %v1748_v58 = vpop.f32.mrf.mxu1 }
 0x1f8   :  { %v4748_v13 = vadd.f32 %v1859_v63, %v1747_v51  ;;  %v1749_v19 = vadd.f32 %v1748_v58, %v4681_v20  ;;  %v1861_v28 = vpop.f32.mrf.mxu0 }
 0x1f9   :  { %v4754_v57 = vpop.f32.mrf.mxu1 }
 0x1fa   :  { %v4756_v6 = vadd.f32 %v1861_v28, %v1749_v19  ;;  %v4758_v25 = vpop.f32.mrf.mxu0 }
 0x1fc   :  { %v1754_v14 = vpop.f32.mrf.mxu1 }
 0x1fd   :  { %v1755_v60 = vadd.f32 %v1754_v14, %v4681_v20  ;;  %v1867_v7 = vpop.f32.mrf.mxu0 }
 0x1fe   :  { %v1756_v8 = vpop.f32.mrf.mxu1 }
 0x1ff   :  { %v4761_v22 = vadd.f32 %v1867_v7, %v1755_v60  ;;  %v1757_v18 = vadd.f32 %v1756_v8, %v4686_v29  ;;  %v1869_v24 = vpop.f32.mrf.mxu0 }
 0x200   :  { %v1758_v12 = vpop.f32.mrf.mxu1 }
 0x201   :  { %v4764_v21 = vadd.f32 %v1869_v24, %v1757_v18  ;;  %v1759_v52 = vadd.f32 %v1758_v12, %v4681_v20  ;;  %v1871_v26 = vpop.f32.mrf.mxu0 }
 0x202   :  { %v4767_v30 = vpop.f32.mrf.mxu1 }
 0x203   :  { %v4769_v43 = vadd.f32 %v1871_v26, %v1759_v52  ;;  %v4771_v2 = vpop.f32.mrf.mxu0 }
 0x205   :  { %v1764_v34 = vpop.f32.mrf.mxu1  ;;  %v1877_v10 = vpop.f32.mrf.mxu0 }
 0x206   :  { %v1765_v54 = vadd.f32 %v1764_v34, %v4681_v20 }
 0x207   :  { %v1766_v53 = vpop.f32.mrf.mxu1  ;;  %v1879_v11 = vpop.f32.mrf.mxu0 }
 0x208   :  { %v4774_v44 = vadd.f32 %v1877_v10, %v1765_v54  ;;  %v1767_v55 = vadd.f32 %v1766_v53, %v4686_v29 }
 0x209   :  { %v1768_v15 = vpop.f32.mrf.mxu1  ;;  %v1881_v49 = vpop.f32.mrf.mxu0 }
 0x20a   :  { %v4777_v23 = vadd.f32 %v1879_v11, %v1767_v55  ;;  %v1769_v47 = vadd.f32 %v1768_v15, %v4681_v20 }
 0x20b   :  { %v1770_v27 = vpop.f32.mrf.mxu1  ;;  %v1883_v3 = vpop.f32.mrf.mxu0 }
 0x20c   :  { %v4780_v39 = vadd.f32 %v1881_v49, %v1769_v47  ;;  %v1771_v45 = vadd.f32 %v1770_v27, %v4686_v29 }
 0x20d   :  { %v1774_v4 = vpop.f32.mrf.mxu1  ;;  %v1887_v42 = vpop.f32.mrf.mxu0 }
 0x20e   :  { %v4783_v32 = vadd.f32 %v1883_v3, %v1771_v45  ;;  %v1775_v62 = vadd.f32 %v1774_v4, %v4681_v20 }
 0x20f   :  { %v1776_v17 = vpop.f32.mrf.mxu1  ;;  %v1889_v37 = vpop.f32.mrf.mxu0 }
 0x210   :  { %v4786_v59 = vadd.f32 %v1887_v42, %v1775_v62  ;;  %v1777_v61 = vadd.f32 %v1776_v17, %v4686_v29 }
 0x211   :  { %v1778_v0 = vpop.f32.mrf.mxu1  ;;  %v1891_v58 = vpop.f32.mrf.mxu0 }
 0x212   :  { %v4789_v51 = vadd.f32 %v1889_v37, %v1777_v61  ;;  %v1779_v63 = vadd.f32 %v1778_v0, %v4681_v20 }
 0x213   :  { %v1780_v19 = vpop.f32.mrf.mxu1  ;;  %v1893_v14 = vpop.f32.mrf.mxu0 }
 0x214   :  { %5269 = vst [vmem:[#allocation15_spill] sm:$0xff] %v4789_v51  ;;  %v4792_v28 = vadd.f32 %v1891_v58, %v1779_v63  ;;  %v1781_v35 = vadd.f32 %v1780_v19, %v4686_v29  ;;  %v5273_v58 = vsub.s32 2, %v5267_v5 }
 0x215   :  { %v1784_v60 = vpop.f32.mrf.mxu1  ;;  %v1897_v18 = vpop.f32.mrf.mxu0 }
 0x216   :  { %v4795_v7 = vadd.f32 %v1893_v14, %v1781_v35  ;;  %v1785_v8 = vadd.f32 %v1784_v60, %v4681_v20  ;;  %v4819_v19 = vrot.slane %v4677_v33, %v5273_v58 }
 0x217   :  { %v1786_v24 = vpop.f32.mrf.mxu1  ;;  %v1899_v26 = vpop.f32.mrf.mxu0 }
 0x218   :  { %v4798_v12 = vadd.f32 %v1897_v18, %v1785_v8  ;;  %v1787_v52 = vadd.f32 %v1786_v24, %v4686_v29  ;;  %v5274_v18 = vsub.s32 3, %v5267_v5 }
 0x219   :  { %v1788_v34 = vpop.f32.mrf.mxu1  ;;  %v1901_v53 = vpop.f32.mrf.mxu0 }
 0x21a   :  { %v4801_v54 = vadd.f32 %v1899_v26, %v1787_v52  ;;  %v1789_v10 = vadd.f32 %v1788_v34, %v4681_v20  ;;  %v4827_v24 = vrot.slane %v4677_v33, %v5274_v18 }
 0x21b   :  { %v1790_v55 = vpop.f32.mrf.mxu1  ;;  %v1903_v47 = vpop.f32.mrf.mxu0 }
 0x21c   :  { %5270 = vst [vmem:[#allocation17_spill] sm:$0xff] %v4801_v54  ;;  %v4804_v11 = vadd.f32 %v1901_v53, %v1789_v10  ;;  %v1791_v15 = vadd.f32 %v1790_v55, %v4686_v29 }
 0x21d   :  { %v1794_v49 = vpop.f32.mrf.mxu1  ;;  %v1907_v3 = vpop.f32.mrf.mxu0 }
 0x21e   :  { %v4807_v27 = vadd.f32 %v1903_v47, %v1791_v15  ;;  %v1795_v45 = vadd.f32 %v1794_v49, %v4681_v20 }
 0x21f   :  { %v1796_v4 = vpop.f32.mrf.mxu1  ;;  %v1909_v17 = vpop.f32.mrf.mxu0 }
 0x220   :  { %5271 = vst [vmem:[#allocation18_spill] sm:$0xff] %v4807_v27  ;;  %v4810_v62 = vadd.f32 %v1907_v3, %v1795_v45  ;;  %v1797_v42 = vadd.f32 %v1796_v4, %v4686_v29 }
 0x221   :  { %v1798_v61 = vpop.f32.mrf.mxu1  ;;  %v1911_v63 = vpop.f32.mrf.mxu0 }
 0x222   :  { %v4813_v37 = vadd.f32 %v1909_v17, %v1797_v42  ;;  %v1799_v0 = vadd.f32 %v1798_v61, %v4681_v20  ;;  %v2368_v42 = vmax.f32 %v4698_v31, 0.0 }
 0x223   :  { %v1800_v35 = vpop.f32.mrf.mxu1  ;;  %v1913_v8 = vpop.f32.mrf.mxu0 }
 0x224   :  { %5272 = vst [vmem:[#allocation13_spill] sm:$0xff] %v4813_v37  ;;  %v4821_v14 = vadd.f32 %v1911_v63, %v1799_v0  ;;  %v1801_v60 = vadd.f32 %v1800_v35, %v4686_v29 }
 0x225   :  { %v1950_v52 = vpop.f32.mrf.mxu1  ;;  %v2063_v34 = vpop.f32.mrf.mxu0 }
 0x226   :  { %v4829_v26 = vadd.f32 %v1913_v8, %v1801_v60  ;;  %v1951_v20 = vadd.f32 %v1950_v52, %v4819_v19 }
 0x227   :  { %v1952_v10 = vpop.f32.mrf.mxu1  ;;  %v2065_v15 = vpop.f32.mrf.mxu0 }
 0x228   :  { %5275 = vst [vmem:[#allocation14_spill] sm:$0xff] %v4829_v26  ;;  %v4832_v53 = vadd.f32 %v2063_v34, %v1951_v20  ;;  %v1953_v55 = vadd.f32 %v1952_v10, %v4827_v24  ;;  %v2374_v20 = vmax.f32 %v4706_v9, 0.0 }
 0x229   :  { %v1954_v47 = vpop.f32.mrf.mxu1  ;;  %v2067_v3 = vpop.f32.mrf.mxu0 }
 0x22a   :  { %v2066_v49 = vadd.f32 %v2065_v15, %v1953_v55  ;;  %v1955_v45 = vadd.f32 %v1954_v47, %v4819_v19 }
 0x22b   :  { %v1956_v4 = vpop.f32.mrf.mxu1  ;;  %v2069_v63 = vpop.f32.mrf.mxu0 }
 0x22c   :  { %v2371_v17 = vmax.f32 %v2066_v49, 0.0  ;;  %v4837_v61 = vadd.f32 %v2067_v3, %v1955_v45  ;;  %v1957_v0 = vadd.f32 %v1956_v4, %v4827_v24  ;;  %v2380_v4 = vmax.f32 %v4720_v48, 0.0 }
 0x22d   :  { %v1960_v58 = vpop.f32.mrf.mxu1  ;;  %v2073_v18 = vpop.f32.mrf.mxu0  ;;  %v2386_v48 = vmax.f32 %v4737_v56, 0.0 }
 0x22e   :  { %v4840_v35 = vmax.f32 %v2368_v42, %v2371_v17  ;;  %v2070_v60 = vadd.f32 %v2069_v63, %v1957_v0  ;;  %v1961_v8 = vadd.f32 %v1960_v58, %v4819_v19 }
 0x22f   :  { %v1962_v52 = vpop.f32.mrf.mxu1  ;;  %v2075_v55 = vpop.f32.mrf.mxu0 }
 0x230   :  { %v2377_v34 = vmax.f32 %v2070_v60, 0.0  ;;  %v4844_v10 = vadd.f32 %v2073_v18, %v1961_v8  ;;  %v1963_v31 = vadd.f32 %v1962_v52, %v4827_v24 }
 0x231   :  { %v1964_v15 = vpop.f32.mrf.mxu1  ;;  %v2077_v3 = vpop.f32.mrf.mxu0 }
 0x232   :  { %v4847_v47 = vmax.f32 %v2374_v20, %v2377_v34  ;;  %v2076_v49 = vadd.f32 %v2075_v55, %v1963_v31  ;;  %v1965_v45 = vadd.f32 %v1964_v15, %v4819_v19 }
 0x233   :  { %v1966_v42 = vpop.f32.mrf.mxu1  ;;  %v2079_v58 = vpop.f32.mrf.mxu0 }
 0x234   :  { %v2383_v9 = vmax.f32 %v2076_v49, 0.0  ;;  %v4853_v0 = vadd.f32 %v2077_v3, %v1965_v45  ;;  %v1967_v63 = vadd.f32 %v1966_v42, %v4827_v24 }
 0x235   :  { %v1970_v60 = vpop.f32.mrf.mxu1 }
 0x236   :  { %v4856_v8 = vmax.f32 %v2380_v4, %v2383_v9  ;;  %v2080_v18 = vadd.f32 %v2079_v58, %v1967_v63  ;;  %v1971_v52 = vadd.f32 %v1970_v60, %v4819_v19  ;;  %v2083_v20 = vpop.f32.mrf.mxu0  ;;  %v2392_v63 = vmax.f32 %v4745_v50, 0.0 }
 0x237   :  { %v1972_v34 = vpop.f32.mrf.mxu1  ;;  %v2398_v50 = vmax.f32 %v4756_v6, 0.0 }
 0x238   :  { %v2389_v31 = vmax.f32 %v2080_v18, 0.0  ;;  %v4860_v55 = vadd.f32 %v2083_v20, %v1971_v52  ;;  %v1973_v15 = vadd.f32 %v1972_v34, %v4827_v24  ;;  %v2085_v49 = vpop.f32.mrf.mxu0 }
 0x239   :  { %v1974_v45 = vpop.f32.mrf.mxu1 }
 0x23a   :  { %v4863_v3 = vmax.f32 %v2386_v48, %v2389_v31  ;;  %v2086_v42 = vadd.f32 %v2085_v49, %v1973_v15  ;;  %v1975_v4 = vadd.f32 %v1974_v45, %v4819_v19  ;;  %v2087_v9 = vpop.f32.mrf.mxu0 }
 0x23b   :  { %v1976_v58 = vpop.f32.mrf.mxu1 }
 0x23c   :  { %v2395_v56 = vmax.f32 %v2086_v42, 0.0  ;;  %v4869_v18 = vadd.f32 %v2087_v9, %v1975_v4  ;;  %v1977_v52 = vadd.f32 %v1976_v58, %v4827_v24  ;;  %v2089_v20 = vpop.f32.mrf.mxu0 }
 0x23d   :  { %v1980_v34 = vpop.f32.mrf.mxu1 }
 0x23e   :  { %v4872_v17 = vmax.f32 %v2392_v63, %v2395_v56  ;;  %v2090_v48 = vadd.f32 %v2089_v20, %v1977_v52  ;;  %v1981_v31 = vadd.f32 %v1980_v34, %v4819_v19  ;;  %v2093_v15 = vpop.f32.mrf.mxu0  ;;  %v2404_v52 = vmax.f32 %v4761_v22, 0.0 }
 0x23f   :  { %v1982_v49 = vpop.f32.mrf.mxu1  ;;  %v2410_v22 = vmax.f32 %v4769_v43, 0.0 }
 0x240   :  { %v2401_v45 = vmax.f32 %v2090_v48, 0.0  ;;  %v4876_v41 = vadd.f32 %v2093_v15, %v1981_v31  ;;  %v1983_v42 = vadd.f32 %v1982_v49, %v4827_v24  ;;  %v2095_v4 = vpop.f32.mrf.mxu0 }
 0x241   :  { %v1984_v9 = vpop.f32.mrf.mxu1 }
 0x242   :  { %v4879_v60 = vmax.f32 %v2398_v50, %v2401_v45  ;;  %v2096_v58 = vadd.f32 %v2095_v4, %v1983_v42  ;;  %v1985_v63 = vadd.f32 %v1984_v9, %v4819_v19  ;;  %v2097_v56 = vpop.f32.mrf.mxu0 }
 0x243   :  { %v1986_v20 = vpop.f32.mrf.mxu1 }
 0x244   :  { %v2407_v6 = vmax.f32 %v2096_v58, 0.0  ;;  %v4885_v48 = vadd.f32 %v2097_v56, %v1985_v63  ;;  %v1987_v31 = vadd.f32 %v1986_v20, %v4827_v24  ;;  %v2099_v15 = vpop.f32.mrf.mxu0 }
 0x245   :  { %v1990_v49 = vpop.f32.mrf.mxu1 }
 0x246   :  { %v4888_v26 = vmax.f32 %v2404_v52, %v2407_v6  ;;  %v2100_v50 = vadd.f32 %v2099_v15, %v1987_v31  ;;  %v1991_v45 = vadd.f32 %v1990_v49, %v4819_v19  ;;  %v2103_v42 = vpop.f32.mrf.mxu0  ;;  %v2416_v31 = vmax.f32 %v4774_v44, 0.0 }
 0x247   :  { %v1992_v4 = vpop.f32.mrf.mxu1  ;;  %v2422_v44 = vmax.f32 %v4780_v39, 0.0 }
 0x248   :  { %v2413_v9 = vmax.f32 %v2100_v50, 0.0  ;;  %v4892_v37 = vadd.f32 %v2103_v42, %v1991_v45  ;;  %v1993_v58 = vadd.f32 %v1992_v4, %v4827_v24  ;;  %v2105_v63 = vpop.f32.mrf.mxu0 }
 0x249   :  { %v1994_v56 = vpop.f32.mrf.mxu1 }
 0x24a   :  { %v4895_v34 = vmax.f32 %v2410_v22, %v2413_v9  ;;  %v2106_v20 = vadd.f32 %v2105_v63, %v1993_v58  ;;  %v1995_v52 = vadd.f32 %v1994_v56, %v4819_v19  ;;  %v2107_v6 = vpop.f32.mrf.mxu0 }
 0x24b   :  { %v1996_v15 = vpop.f32.mrf.mxu1 }
 0x24c   :  { %v2419_v43 = vmax.f32 %v2106_v20, 0.0  ;;  %v4901_v50 = vadd.f32 %v2107_v6, %v1995_v52  ;;  %v1997_v45 = vadd.f32 %v1996_v15, %v4827_v24  ;;  %v2109_v42 = vpop.f32.mrf.mxu0 }
 0x24d   :  { %v2000_v4 = vpop.f32.mrf.mxu1 }
 0x24e   :  { %v4904_v27 = vmax.f32 %v2416_v31, %v2419_v43  ;;  %v2110_v22 = vadd.f32 %v2109_v42, %v1997_v45  ;;  %v2001_v9 = vadd.f32 %v2000_v4, %v4819_v19  ;;  %v2113_v58 = vpop.f32.mrf.mxu0  ;;  %v2428_v45 = vmax.f32 %v4786_v59, 0.0 }
 0x24f   :  { %v2002_v63 = vpop.f32.mrf.mxu1  ;;  %v2434_v59 = vmax.f32 %v4792_v28, 0.0 }
 0x250   :  { %v2425_v56 = vmax.f32 %v2110_v22, 0.0  ;;  %v4908_v54 = vadd.f32 %v2113_v58, %v2001_v9  ;;  %v2003_v20 = vadd.f32 %v2002_v63, %v4827_v24  ;;  %v2115_v52 = vpop.f32.mrf.mxu0 }
 0x251   :  { %v2004_v6 = vpop.f32.mrf.mxu1 }
 0x252   :  { %5276 = vst [vmem:[#allocation16_spill] sm:$0xff] %v4908_v54  ;;  %v4911_v49 = vmax.f32 %v2422_v44, %v2425_v56  ;;  %v2116_v15 = vadd.f32 %v2115_v52, %v2003_v20  ;;  %v2005_v31 = vadd.f32 %v2004_v6, %v4819_v19  ;;  %v2117_v43 = vpop.f32.mrf.mxu0 }
 0x253   :  { %v2006_v42 = vpop.f32.mrf.mxu1 }
 0x254   :  { %v2431_v39 = vmax.f32 %v2116_v15, 0.0  ;;  %v4917_v22 = vadd.f32 %v2117_v43, %v2005_v31  ;;  %v2007_v9 = vadd.f32 %v2006_v42, %v4827_v24  ;;  %v2119_v58 = vpop.f32.mrf.mxu0 }
 0x255   :  { %v2010_v63 = vpop.f32.mrf.mxu1 }
 0x256   :  { %5277 = vst [vmem:[#allocation12_spill] sm:$0xff] %v4917_v22  ;;  %v4920_v54 = vmax.f32 %v2428_v45, %v2431_v39  ;;  %v2120_v44 = vadd.f32 %v2119_v58, %v2007_v9  ;;  %v2011_v56 = vadd.f32 %v2010_v63, %v4819_v19  ;;  %v2123_v20 = vpop.f32.mrf.mxu0  ;;  %v2440_v9 = vmax.f32 %v4798_v12, 0.0 }
 0x257   :  { %v2012_v52 = vpop.f32.mrf.mxu1  ;;  %v2446_v12 = vmax.f32 %v4804_v11, 0.0 }
 0x258   :  { %v2437_v6 = vmax.f32 %v2120_v44, 0.0  ;;  %v4924_v51 = vadd.f32 %v2123_v20, %v2011_v56  ;;  %v2013_v15 = vadd.f32 %v2012_v52, %v4827_v24  ;;  %v2125_v31 = vpop.f32.mrf.mxu0 }
 0x259   :  { %v2014_v43 = vpop.f32.mrf.mxu1 }
 0x25a   :  { %5278 = vst [vmem:[#allocation6_spill] sm:$0xff] %v4924_v51  ;;  %v4927_v4 = vmax.f32 %v2434_v59, %v2437_v6  ;;  %v2126_v42 = vadd.f32 %v2125_v31, %v2013_v15  ;;  %v2015_v45 = vadd.f32 %v2014_v43, %v4819_v19  ;;  %v2127_v39 = vpop.f32.mrf.mxu0 }
 0x25b   :  { %v2016_v58 = vpop.f32.mrf.mxu1 }
 0x25c   :  { %v2443_v28 = vmax.f32 %v2126_v42, 0.0  ;;  %v4933_v44 = vadd.f32 %v2127_v39, %v2015_v45  ;;  %v2017_v56 = vadd.f32 %v2016_v58, %v4827_v24  ;;  %v2129_v20 = vpop.f32.mrf.mxu0 }
 0x25d   :  { %v2020_v52 = vpop.f32.mrf.mxu1 }
 0x25e   :  { %v4936_v51 = vmax.f32 %v2440_v9, %v2443_v28  ;;  %v2130_v59 = vadd.f32 %v2129_v20, %v2017_v56  ;;  %v2021_v6 = vadd.f32 %v2020_v52, %v4819_v19  ;;  %v2133_v15 = vpop.f32.mrf.mxu0  ;;  %v2452_v56 = vmax.f32 %v4810_v62, 0.0 }
 0x25f   :  { %v2022_v31 = vpop.f32.mrf.mxu1  ;;  %v5282_v52 = vsub.s32 4, %v5267_v5 }
 0x260   :  { %5279 = vst [vmem:[#allocation7_spill] sm:$0xff] %v4936_v51  ;;  %v2449_v43 = vmax.f32 %v2130_v59, 0.0  ;;  %v4940_v22 = vadd.f32 %v2133_v15, %v2021_v6  ;;  %v2023_v42 = vadd.f32 %v2022_v31, %v4827_v24  ;;  %v2135_v45 = vpop.f32.mrf.mxu0 }
 0x261   :  { %v2024_v39 = vpop.f32.mrf.mxu1  ;;  %v4950_v11 = vrot.slane %v4677_v33, %v5282_v52  ;;  %v1731_v52 = vadd.f32 %v4704_v36, %v4686_v29 }
 0x262   :  { %5280 = vst [vmem:[#allocation8_spill] sm:$0xff] %v4940_v22  ;;  %v4943_v63 = vmax.f32 %v2446_v12, %v2449_v43  ;;  %v2136_v58 = vadd.f32 %v2135_v45, %v2023_v42  ;;  %v2025_v9 = vadd.f32 %v2024_v39, %v4819_v19  ;;  %v2137_v28 = vpop.f32.mrf.mxu0  ;;  %v5284_v19 = vsub.s32 5, %v5267_v5 }
 0x263   :  { %v2026_v20 = vpop.f32.mrf.mxu1 }
 0x264   :  { %5281 = vst [vmem:[#allocation9_spill] sm:$0xff] %v4943_v63  ;;  %v2455_v6 = vmax.f32 %v2136_v58, 0.0  ;;  %v4954_v15 = vadd.f32 %v2137_v28, %v2025_v9  ;;  %v2027_v31 = vadd.f32 %v2026_v20, %v4827_v24  ;;  %v2139_v12 = vpop.f32.mrf.mxu0  ;;  %v4960_v43 = vrot.slane %v4677_v33, %v5284_v19 }
 0x265   :  { %v2458_v9 = vmax.f32 %v4821_v14, 0.0 }
 0x266   :  { %5283 = vst [vmem:[#allocation19_spill] sm:$0xff] %v4954_v15  ;;  %v4962_v62 = vmax.f32 %v2452_v56, %v2455_v6  ;;  %v2140_v42 = vadd.f32 %v2139_v12, %v2027_v31  ;;  %v2176_v45 = vpop.f32.mrf.mxu1  ;;  %v2289_v39 = vpop.f32.mrf.mxu0  ;;  %v1844_v31 = vadd.f32 %v4708_v40, %v1731_v52 }
 0x267   :  { %v2177_v58 = vadd.f32 %v2176_v45, %v4950_v11 }
 0x268   :  { %5285 = vst [vmem:[#allocation20_spill] sm:$0xff] %v4962_v62  ;;  %v2461_v28 = vmax.f32 %v2140_v42, 0.0  ;;  %v2178_v24 = vpop.f32.mrf.mxu1  ;;  %v2291_v20 = vpop.f32.mrf.mxu0 }
 0x269   :  { %v2179_v59 = vadd.f32 %v2178_v24, %v4960_v43  ;;  %v2290_v33 = vadd.f32 %v2289_v39, %v2177_v58  ;;  %v2375_v24 = vmax.f32 %v1844_v31, 0.0 }
 0x26a   :  { %v4969_v5 = vmax.f32 %v2458_v9, %v2461_v28  ;;  %v2180_v56 = vpop.f32.mrf.mxu1  ;;  %v2293_v6 = vpop.f32.mrf.mxu0  ;;  %v1741_v9 = vadd.f32 %v4735_v46, %v4686_v29 }
 0x26b   :  { %v2181_v12 = vadd.f32 %v2180_v56, %v4950_v11  ;;  %v2292_v19 = vadd.f32 %v2291_v20, %v2179_v59  ;;  %v2372_v28 = vmax.f32 %v2290_v33, 0.0  ;;  %v2369_v56 = vmax.f32 %v4701_v38, 0.0 }
 0x26c   :  { %5286 = vst [vmem:[#allocation21_spill] sm:$0xff] %v4969_v5  ;;  %v2182_v45 = vpop.f32.mrf.mxu1  ;;  %v2295_v14 = vpop.f32.mrf.mxu0  ;;  %v1854_v46 = vadd.f32 %v4739_v1, %v1741_v9  ;;  %v2370_v33 = vmax.f32 %v4832_v53, 0.0  ;;  %v1751_v1 = vadd.f32 %v4754_v57, %v4686_v29  ;;  %v2388_v57 = vmax.f32 %v4853_v0, 0.0 }
 0x26d   :  { %v2294_v42 = vadd.f32 %v2293_v6, %v2181_v12  ;;  %v2183_v15 = vadd.f32 %v2182_v45, %v4960_v43  ;;  %v2373_v36 = vmax.f32 %v2292_v19, 0.0  ;;  %v2376_v6 = vmax.f32 %v4837_v61, 0.0 }
 0x26e   :  { %v2186_v39 = vpop.f32.mrf.mxu1  ;;  %v2299_v58 = vpop.f32.mrf.mxu0  ;;  %v2465_v31 = vmax.f32 %v2369_v56, %v2372_v28 }
 0x26f   :  { %v2378_v22 = vmax.f32 %v2294_v42, 0.0  ;;  %v2296_v40 = vadd.f32 %v2295_v14, %v2183_v15  ;;  %v2187_v52 = vadd.f32 %v2186_v39, %v4950_v11  ;;  %v2466_v19 = vmax.f32 %v2370_v33, %v2373_v36 }
 0x270   :  { %v2188_v59 = vpop.f32.mrf.mxu1  ;;  %v2301_v20 = vpop.f32.mrf.mxu0 }
 0x271   :  { %v2468_v12 = vmax.f32 %v2375_v24, %v2378_v22  ;;  %v2379_v45 = vmax.f32 %v2296_v40, 0.0  ;;  %v2189_v62 = vadd.f32 %v2188_v59, %v4960_v43  ;;  %v2300_v42 = vadd.f32 %v2299_v58, %v2187_v52 }
 0x272   :  { %v2190_v15 = vpop.f32.mrf.mxu1  ;;  %v2303_v14 = vpop.f32.mrf.mxu0  ;;  %v2387_v40 = vmax.f32 %v1854_v46, 0.0  ;;  %v5287_v59 = vpack.c.bf16 %v4847_v47, %v4840_v35  ;;  %v1864_v35 = vadd.f32 %v4758_v25, %v1751_v1  ;;  %v2393_v25 = vmax.f32 %v4748_v13, 0.0 }
 0x273   :  { %v2469_v39 = vmax.f32 %v2376_v6, %v2379_v45  ;;  %v2302_v5 = vadd.f32 %v2301_v20, %v2189_v62  ;;  %v2191_v38 = vadd.f32 %v2190_v15, %v4950_v11  ;;  %v2513_v61 = vpack.c.bf16 %v2468_v12, %v2465_v31 }
 0x274   :  { %v2192_v51 = vpop.f32.mrf.mxu1  ;;  %v2305_v63 = vpop.f32.mrf.mxu0  ;;  %v2384_v53 = vmax.f32 %v2300_v42, 0.0  ;;  %v2382_v20 = vmax.f32 %v4844_v10, 0.0  ;;  %v2399_v1 = vmax.f32 %v1864_v35, 0.0  ;;  %v2394_v13 = vmax.f32 %v4860_v55, 0.0 }
 0x275   :  { %v2304_v22 = vadd.f32 %v2303_v14, %v2191_v38  ;;  %v2193_v24 = vadd.f32 %v2192_v51, %v4960_v43  ;;  %2767 = vmatprep.mubr.bf16.mxu1 %v2513_v61  ;;  %v2514_v58 = vpack.c.bf16 %v2469_v39, %v2466_v19  ;;  %v2385_v52 = vmax.f32 %v2302_v5, 0.0 }
 0x276   :  { %v2196_v9 = vpop.f32.mrf.mxu1  ;;  %v2309_v28 = vpop.f32.mrf.mxu0  ;;  %2768 = vmatmul.mubr.bf16.vlgmr.msra.gmra.mxu1 %v5287_v59  ;;  %v2381_v51 = vmax.f32 %v4732_v16, 0.0  ;;  %v1761_v38 = vadd.f32 %v4767_v30, %v4686_v29 }
 0x277   :  { %v2390_v62 = vmax.f32 %v2304_v22, 0.0  ;;  %v2306_v56 = vadd.f32 %v2305_v63, %v2193_v24  ;;  %v2197_v36 = vadd.f32 %v2196_v9, %v4950_v11  ;;  %3494 = vmatprep.mubr.bf16.mxu0 %v2514_v58  ;;  %v2472_v47 = vmax.f32 %v2382_v20, %v2385_v52 }
 0x278   :  { %v2198_v6 = vpop.f32.mrf.mxu1  ;;  %v2311_v12 = vpop.f32.mrf.mxu0  ;;  %v2471_v33 = vmax.f32 %v2381_v51, %v2384_v53  ;;  %v5288_v58 = vpack.c.bf16 %v4863_v3, %v4856_v8  ;;  %v2400_v20 = vmax.f32 %v4869_v18, 0.0 }
 0x279   :  { %v2474_v45 = vmax.f32 %v2387_v40, %v2390_v62  ;;  %v2391_v46 = vmax.f32 %v2306_v56, 0.0  ;;  %v2310_v5 = vadd.f32 %v2309_v28, %v2197_v36  ;;  %v2199_v63 = vadd.f32 %v2198_v6, %v4960_v43 }
 0x27a   :  { %v2200_v31 = vpop.f32.mrf.mxu1  ;;  %v2313_v42 = vpop.f32.mrf.mxu0  ;;  %v1874_v56 = vadd.f32 %v4771_v2, %v1761_v38  ;;  %v2405_v38 = vmax.f32 %v4764_v21, 0.0 }
 0x27b   :  { %v2475_v15 = vmax.f32 %v2388_v57, %v2391_v46  ;;  %v2201_v16 = vadd.f32 %v2200_v31, %v4950_v11  ;;  %v2312_v10 = vadd.f32 %v2311_v12, %v2199_v63  ;;  %v2516_v39 = vpack.c.bf16 %v2474_v45, %v2471_v33 }
 0x27c   :  { %v2202_v14 = vpop.f32.mrf.mxu1  ;;  %v2315_v0 = vpop.f32.mrf.mxu0  ;;  %v2396_v61 = vmax.f32 %v2310_v5, 0.0  ;;  %v2411_v35 = vmax.f32 %v1874_v56, 0.0 }
 0x27d   :  { %v2517_v19 = vpack.c.bf16 %v2475_v15, %v2472_v47  ;;  %v2314_v22 = vadd.f32 %v2313_v42, %v2201_v16  ;;  %v2203_v24 = vadd.f32 %v2202_v14, %v4960_v43  ;;  %2775 = vmatprep.mubr.bf16.mxu1 %v2516_v39  ;;  %v2397_v29 = vmax.f32 %v2312_v10, 0.0 }
 0x27e   :  { %v2206_v40 = vpop.f32.mrf.mxu1  ;;  %v2319_v53 = vpop.f32.mrf.mxu0  ;;  %2776 = vmatmul.mubr.bf16.gmra.mxu1 %v5288_v58  ;;  %v2477_v36 = vmax.f32 %v2393_v25, %v2396_v61  ;;  %v5289_v39 = vpack.c.bf16 %v4879_v60, %v4872_v17  ;;  %v2412_v61 = vmax.f32 %v4885_v48, 0.0 }
 0x27f   :  { %v2402_v9 = vmax.f32 %v2314_v22, 0.0  ;;  %v2207_v28 = vadd.f32 %v2206_v40, %v4950_v11  ;;  %3495 = vmatmul.mubr.bf16.vlgmr.msra.gmra.mxu0 %v2517_v19  ;;  %v2316_v30 = vadd.f32 %v2315_v0, %v2203_v24  ;;  %v2478_v5 = vmax.f32 %v2394_v13, %v2397_v29 }
 0x280   :  { %v2208_v52 = vpop.f32.mrf.mxu1  ;;  %v2321_v62 = vpop.f32.mrf.mxu0  ;;  %v2406_v19 = vmax.f32 %v4876_v41, 0.0  ;;  %v2417_v13 = vmax.f32 %v4777_v23, 0.0  ;;  %v2418_v23 = vmax.f32 %v4892_v37, 0.0  ;;  %v2435_v37 = vmax.f32 %v4795_v7, 0.0 }
 0x281   :  { %v2480_v59 = vmax.f32 %v2399_v1, %v2402_v9  ;;  %v2209_v51 = vadd.f32 %v2208_v52, %v4960_v43  ;;  %v2403_v57 = vmax.f32 %v2316_v30, 0.0  ;;  %v2320_v6 = vadd.f32 %v2319_v53, %v2207_v28 }
 0x282   :  { %v2210_v12 = vpop.f32.mrf.mxu1  ;;  %v2323_v8 = vpop.f32.mrf.mxu0 }
 0x283   :  { %v2322_v3 = vadd.f32 %v2321_v62, %v2209_v51  ;;  %v2211_v45 = vadd.f32 %v2210_v12, %v4950_v11  ;;  %v2519_v46 = vpack.c.bf16 %v2480_v59, %v2477_v36  ;;  %v2481_v63 = vmax.f32 %v2400_v20, %v2403_v57 }
 0x284   :  { %v2212_v33 = vpop.f32.mrf.mxu1  ;;  %v2325_v2 = vpop.f32.mrf.mxu0  ;;  %v2408_v55 = vmax.f32 %v2320_v6, 0.0  ;;  %v2423_v20 = vmax.f32 %v4783_v32, 0.0  ;;  %v5290_v12 = vpack.c.bf16 %v4895_v34, %v4888_v26  ;;  %v2424_v32 = vmax.f32 %v4901_v50, 0.0 }
 0x285   :  { %v2324_v31 = vadd.f32 %v2323_v8, %v2211_v45  ;;  %v2213_v42 = vadd.f32 %v2212_v33, %v4960_v43  ;;  %2783 = vmatprep.mubr.bf16.mxu1 %v2519_v46  ;;  %v2520_v15 = vpack.c.bf16 %v2481_v63, %v2478_v5  ;;  %v2409_v16 = vmax.f32 %v2322_v3, 0.0 }
 0x286   :  { %v2216_v47 = vpop.f32.mrf.mxu1  ;;  %v2329_v18 = vpop.f32.mrf.mxu0  ;;  %2784 = vmatmul.mubr.bf16.gmra.mxu1 %v5289_v39  ;;  %v2483_v9 = vmax.f32 %v2405_v38, %v2408_v55 }
 0x287   :  { %v2414_v10 = vmax.f32 %v2324_v31, 0.0  ;;  %v2326_v14 = vadd.f32 %v2325_v2, %v2213_v42  ;;  %v2217_v0 = vadd.f32 %v2216_v47, %v4950_v11  ;;  %3498 = vmatprep.mubr.bf16.mxu0 %v2520_v15  ;;  %v2484_v29 = vmax.f32 %v2406_v19, %v2409_v16 }
 0x288   :  { %v2218_v22 = vpop.f32.mrf.mxu1  ;;  %v2331_v24 = vpop.f32.mrf.mxu0 }
 0x289   :  { %v2486_v40 = vmax.f32 %v2411_v35, %v2414_v10  ;;  %v2415_v53 = vmax.f32 %v2326_v14, 0.0  ;;  %v2330_v25 = vadd.f32 %v2329_v18, %v2217_v0  ;;  %v2219_v1 = vadd.f32 %v2218_v22, %v4960_v43 }
 0x28a   :  { %v2220_v28 = vpop.f32.mrf.mxu1  ;;  %v2333_v58 = vpop.f32.mrf.mxu0 }
 0x28b   :  { %v2487_v17 = vmax.f32 %v2412_v61, %v2415_v53  ;;  %v2221_v60 = vadd.f32 %v2220_v28, %v4950_v11  ;;  %v2332_v21 = vadd.f32 %v2331_v24, %v2219_v1  ;;  %v2522_v52 = vpack.c.bf16 %v2486_v40, %v2483_v9  ;;  %v5292_v53 = vld [vmem:[#allocation15_spill] sm:$0xff]  ;;  %v5293_v1 = vld [vmem:[#allocation16_spill] sm:$0xff] }
 0x28c   :  { %v2222_v30 = vpop.f32.mrf.mxu1  ;;  %v2335_v41 = vpop.f32.mrf.mxu0  ;;  %v2420_v62 = vmax.f32 %v2330_v25, 0.0  ;;  %v5291_v40 = vpack.c.bf16 %v4911_v49, %v4904_v27  ;;  %v2429_v25 = vmax.f32 %v5292_v53, 0.0  ;;  %v2430_v9 = vmax.f32 %v5293_v1, 0.0  ;;  %v5294_v28 = vld [vmem:[#allocation12_spill] sm:$0xff] }
 0x28d   :  { %v2523_v48 = vpack.c.bf16 %v2487_v17, %v2484_v29  ;;  %v2334_v56 = vadd.f32 %v2333_v58, %v2221_v60  ;;  %v2223_v36 = vadd.f32 %v2222_v30, %v4960_v43  ;;  %2791 = vmatprep.mubr.bf16.mxu1 %v2522_v52  ;;  %v2421_v8 = vmax.f32 %v2332_v21, 0.0 }
 0x28e   :  { %v2226_v59 = vpop.f32.mrf.mxu1  ;;  %v2339_v51 = vpop.f32.mrf.mxu0  ;;  %2792 = vmatmul.mubr.bf16.gmra.mxu1 %v5290_v12  ;;  %v2489_v5 = vmax.f32 %v2417_v13, %v2420_v62  ;;  %v2436_v58 = vmax.f32 %v5294_v28, 0.0 }
 0x28f   :  { %v2426_v57 = vmax.f32 %v2334_v56, 0.0  ;;  %v2227_v6 = vadd.f32 %v2226_v59, %v4950_v11  ;;  %3499 = vmatmul.mubr.bf16.gmra.mxu0 %v2523_v48  ;;  %v2336_v3 = vadd.f32 %v2335_v41, %v2223_v36  ;;  %v2490_v47 = vmax.f32 %v2418_v23, %v2421_v8 }
 0x290   :  { %v2228_v45 = vpop.f32.mrf.mxu1  ;;  %v2341_v46 = vpop.f32.mrf.mxu0  ;;  %v5297_v23 = vpack.c.bf16 %v4927_v4, %v4920_v54 }
 0x291   :  { %v2492_v63 = vmax.f32 %v2423_v20, %v2426_v57  ;;  %v2229_v33 = vadd.f32 %v2228_v45, %v4960_v43  ;;  %v2427_v2 = vmax.f32 %v2336_v3, 0.0  ;;  %v2340_v31 = vadd.f32 %v2339_v51, %v2227_v6  ;;  %v5295_v3 = vld [vmem:[#allocation17_spill] sm:$0xff] }
 0x292   :  { %v2230_v42 = vpop.f32.mrf.mxu1  ;;  %v2343_v35 = vpop.f32.mrf.mxu0  ;;  %v2441_v45 = vmax.f32 %v5295_v3, 0.0 }
 0x293   :  { %v2342_v55 = vadd.f32 %v2341_v46, %v2229_v33  ;;  %v2231_v26 = vadd.f32 %v2230_v42, %v4950_v11  ;;  %v2525_v34 = vpack.c.bf16 %v2492_v63, %v2489_v5  ;;  %v2493_v18 = vmax.f32 %v2424_v32, %v2427_v2  ;;  %v5296_v46 = vld [vmem:[#allocation18_spill] sm:$0xff] }
 0x294   :  { %v2232_v15 = vpop.f32.mrf.mxu1  ;;  %v2345_v16 = vpop.f32.mrf.mxu0  ;;  %v2432_v0 = vmax.f32 %v2340_v31, 0.0  ;;  %v2447_v5 = vmax.f32 %v5296_v46, 0.0 }
 0x295   :  { %v2344_v10 = vadd.f32 %v2343_v35, %v2231_v26  ;;  %v2233_v14 = vadd.f32 %v2232_v15, %v4960_v43  ;;  %2799 = vmatprep.mubr.bf16.mxu1 %v2525_v34  ;;  %v2526_v38 = vpack.c.bf16 %v2493_v18, %v2490_v47  ;;  %v2433_v19 = vmax.f32 %v2342_v55, 0.0  ;;  %v5298_v47 = vld [vmem:[#allocation6_spill] sm:$0xff] }
 0x296   :  { %v2236_v50 = vpop.f32.mrf.mxu1  ;;  %v2349_v39 = vpop.f32.mrf.mxu0  ;;  %2800 = vmatmul.mubr.bf16.gmra.mxu1 %v5291_v40  ;;  %v2495_v41 = vmax.f32 %v2429_v25, %v2432_v0  ;;  %v2442_v18 = vmax.f32 %v5298_v47, 0.0  ;;  %v2448_v15 = vmax.f32 %v4933_v44, 0.0  ;;  %v5300_v44 = vld [vmem:[#allocation14_spill] sm:$0xff] }
 0x297   :  { %v2438_v61 = vmax.f32 %v2344_v10, 0.0  ;;  %v2346_v22 = vadd.f32 %v2345_v16, %v2233_v14  ;;  %v2237_v24 = vadd.f32 %v2236_v50, %v4950_v11  ;;  %3502 = vmatprep.mubr.bf16.mxu0 %v2526_v38  ;;  %v2496_v62 = vmax.f32 %v2430_v9, %v2433_v19 }
 0x298   :  { %v2238_v7 = vpop.f32.mrf.mxu1  ;;  %v2351_v29 = vpop.f32.mrf.mxu0  ;;  %v2459_v25 = vmax.f32 %v5300_v44, 0.0 }
 0x299   :  { %v2498_v17 = vmax.f32 %v2435_v37, %v2438_v61  ;;  %v2439_v60 = vmax.f32 %v2346_v22, 0.0  ;;  %v2350_v21 = vadd.f32 %v2349_v39, %v2237_v24  ;;  %v2239_v30 = vadd.f32 %v2238_v7, %v4960_v43  ;;  %v5299_v24 = vld [vmem:[#allocation13_spill] sm:$0xff] }
 0x29a   :  { %v2240_v52 = vpop.f32.mrf.mxu1  ;;  %v2353_v48 = vpop.f32.mrf.mxu0  ;;  %v2453_v40 = vmax.f32 %v5299_v24, 0.0 }
 0x29b   :  { %v2499_v27 = vmax.f32 %v2436_v58, %v2439_v60  ;;  %v2241_v49 = vadd.f32 %v2240_v52, %v4950_v11  ;;  %v2352_v56 = vadd.f32 %v2351_v29, %v2239_v30  ;;  %v2528_v51 = vpack.c.bf16 %v2498_v17, %v2495_v41  ;;  %v5301_v58 = vld [vmem:[#allocation9_spill] sm:$0xff]  ;;  %v5304_v29 = vld [vmem:[#allocation8_spill] sm:$0xff]  ;;  %v5305_v60 = vld [vmem:[#allocation19_spill] sm:$0xff] }
 0x29c   :  { %v2242_v36 = vpop.f32.mrf.mxu1  ;;  %v2355_v59 = vpop.f32.mrf.mxu0  ;;  %v2444_v20 = vmax.f32 %v2350_v21, 0.0  ;;  %v2454_v17 = vmax.f32 %v5304_v29, 0.0  ;;  %v2460_v21 = vmax.f32 %v5305_v60, 0.0 }
 0x29d   :  { %v2529_v13 = vpack.c.bf16 %v2499_v27, %v2496_v62  ;;  %v2354_v57 = vadd.f32 %v2353_v48, %v2241_v49  ;;  %v2243_v6 = vadd.f32 %v2242_v36, %v4960_v43  ;;  %2807 = vmatprep.mubr.bf16.mxu1 %v2528_v51  ;;  %v2445_v32 = vmax.f32 %v2352_v56, 0.0  ;;  %v5306_v49 = vld [vmem:[#allocation21_spill] sm:$0xff]  ;;  %v5307_v56 = vld [vmem:[#allocation20_spill] sm:$0xff] }
 0x29e   :  { %v2246_v12 = vpop.f32.mrf.mxu1  ;;  %v2359_v8 = vpop.f32.mrf.mxu0  ;;  %2808 = vmatmul.mubr.bf16.gmra.mxu1 %v5297_v23  ;;  %v2501_v35 = vmax.f32 %v2441_v45, %v2444_v20  ;;  %v5308_v36 = vpack.c.bf16 %v5306_v49, %v5307_v56 }
 0x29f   :  { %v2450_v63 = vmax.f32 %v2354_v57, 0.0  ;;  %v2247_v33 = vadd.f32 %v2246_v12, %v4950_v11  ;;  %3503 = vmatmul.mubr.bf16.gmra.mxu0 %v2529_v13  ;;  %v2356_v2 = vadd.f32 %v2355_v59, %v2243_v6  ;;  %v2502_v0 = vmax.f32 %v2442_v18, %v2445_v32  ;;  %v5068_v6 = vld [vmem:[%s5187_s6] ss:$0 sm:$0xff] }
 0x2a0   :  { %v2248_v31 = vpop.f32.mrf.mxu1  ;;  %v2361_v42 = vpop.f32.mrf.mxu0 }
 0x2a1   :  { %v2504_v55 = vmax.f32 %v2447_v5, %v2450_v63  ;;  %v2360_v26 = vadd.f32 %v2359_v8, %v2247_v33  ;;  %v2249_v34 = vadd.f32 %v2248_v31, %v4960_v43  ;;  %v2451_v16 = vmax.f32 %v2356_v2, 0.0  ;;  %v5074_v2 = vld [vmem:[%s5188_s7] ss:$0 sm:$0xff] }
 0x2a2   :  { %v2250_v10 = vpop.f32.mrf.mxu1  ;;  %v2363_v14 = vpop.f32.mrf.mxu0 }
 0x2a3   :  { %v2362_v37 = vadd.f32 %v2361_v42, %v2249_v34  ;;  %v2251_v54 = vadd.f32 %v2250_v10, %v4950_v11  ;;  %v2531_v4 = vpack.c.bf16 %v2504_v55, %v2501_v35  ;;  %v2505_v50 = vmax.f32 %v2448_v15, %v2451_v16  ;;  %v5302_v11 = vld [vmem:[#allocation7_spill] sm:$0xff] }
 0x2a4   :  { %v2252_v39 = vpop.f32.mrf.mxu1  ;;  %v2365_v38 = vpop.f32.mrf.mxu0  ;;  %v2456_v19 = vmax.f32 %v2360_v26, 0.0  ;;  %v5303_v7 = vpack.c.bf16 %v5301_v58, %v5302_v11 }
 0x2a5   :  { %v2364_v61 = vadd.f32 %v2363_v14, %v2251_v54  ;;  %v2253_v22 = vadd.f32 %v2252_v39, %v4960_v43  ;;  %2815 = vmatprep.mubr.bf16.mxu1 %v2531_v4  ;;  %v2532_v53 = vpack.c.bf16 %v2505_v50, %v2502_v0  ;;  %v2457_v1 = vmax.f32 %v2362_v37, 0.0 }
 0x2a6   :  { %2816 = vmatmul.mubr.bf16.gmra.mxu1 %v5303_v7  ;;  %v2507_v30 = vmax.f32 %v2453_v40, %v2456_v19 }
 0x2a7   :  { %v2462_v9 = vmax.f32 %v2364_v61, 0.0  ;;  %v2366_v28 = vadd.f32 %v2365_v38, %v2253_v22  ;;  %3506 = vmatprep.mubr.bf16.mxu0 %v2532_v53  ;;  %v2508_v52 = vmax.f32 %v2454_v17, %v2457_v1 }
 0x2a9   :  { %v2510_v43 = vmax.f32 %v2459_v25, %v2462_v9  ;;  %v2463_v41 = vmax.f32 %v2366_v28, 0.0 }
 0x2ab   :  { %v2511_v48 = vmax.f32 %v2460_v21, %v2463_v41  ;;  %v2534_v62 = vpack.c.bf16 %v2510_v43, %v2507_v30 }
 0x2ad   :  { %v2535_v27 = vpack.c.bf16 %v2511_v48, %v2508_v52  ;;  %2823 = vmatprep.mubr.bf16.mxu1 %v2534_v62 }
 0x2ae   :  { %2824 = vmatmul.mubr.bf16.gmra.mxu1 %v5308_v36 }
 0x2af   :  { %3507 = vmatmul.mubr.bf16.gmra.mxu0 %v2535_v27 }
 0x336   :  { %v3414_v59 = vpop.f32.mrf.mxu1 }
 0x338   :  { %v3415_v51 = vpop.f32.mrf.mxu1 }
 0x339   :  { %v3416_v20 = vadd.f32 %v3415_v51, %v3414_v59 }
 0x33a   :  { %v3417_v13 = vpop.f32.mrf.mxu1 }
 0x33b   :  { %v2770_v45 = vadd.f32 %v3416_v20, %v5068_v6 }
 0x33c   :  { %v3418_v57 = vpop.f32.mrf.mxu1 }
 0x33d   :  { %v3419_v3 = vadd.f32 %v3418_v57, %v3417_v13 }
 0x33e   :  { %v3420_v12 = vpop.f32.mrf.mxu1 }
 0x33f   :  { %v3496_v8 = vpop.f32.mrf.mxu0  ;;  %v2773_v35 = vadd.f32 %v3419_v3, %v5068_v6 }
 0x340   :  { %v3421_v46 = vpop.f32.mrf.mxu1 }
 0x341   :  { %v2866_v5 = vpop.f32.mrf.mxu0  ;;  %v3422_v63 = vadd.f32 %v3421_v46, %v3420_v12 }
 0x342   :  { %v2867_v33 = vadd.f32 %v2866_v5, %v2770_v45  ;;  %v3423_v23 = vpop.f32.mrf.mxu1 }
 0x343   :  { %v3497_v32 = vpop.f32.mrf.mxu0  ;;  %v2778_v31 = vadd.f32 %v3422_v63, %v5068_v6 }
 0x344   :  { %v2929_v42 = vmax.f32 %v2867_v33, 0.0  ;;  %v3424_v55 = vpop.f32.mrf.mxu1 }
 0x345   :  { %v2869_v26 = vpop.f32.mrf.mxu0  ;;  %v3425_v34 = vadd.f32 %v3424_v55, %v3423_v23  ;;  %v2875_v15 = vadd.f32 %v3496_v8, %v2778_v31 }
 0x346   :  { %v2870_v47 = vadd.f32 %v2869_v26, %v2773_v35  ;;  %v2952_v18 = vmul.f32 %v5074_v2, %v2929_v42  ;;  %v3426_v16 = vpop.f32.mrf.mxu1 }
 0x347   :  { %v2781_v10 = vadd.f32 %v3425_v34, %v5068_v6  ;;  %v2931_v54 = vmax.f32 %v2875_v15, 0.0 }
 0x348   :  { %v2930_v14 = vmax.f32 %v2870_v47, 0.0  ;;  %v2969_v37 = vsel %vm2968_vm2, %v2952_v18, 0.0  ;;  %v3427_v4 = vpop.f32.mrf.mxu1 }
 0x349   :  { %2970 = vadd.xlane.f32.xlu0 %v2969_v37  ;;  %v2878_v0 = vadd.f32 %v3497_v32, %v2781_v10  ;;  %v2954_v50 = vmul.f32 %v5074_v2, %v2931_v54  ;;  %v3428_v19 = vadd.f32 %v3427_v4, %v3426_v16 }
 0x34a   :  { %v2953_v39 = vmul.f32 %v5074_v2, %v2930_v14  ;;  %v3429_v38 = vpop.f32.mrf.mxu1 }
 0x34b   :  { %v2975_v61 = vsel %vm2968_vm2, %v2954_v50, 0.0  ;;  %v2932_v24 = vmax.f32 %v2878_v0, 0.0  ;;  %v2786_v28 = vadd.f32 %v3428_v19, %v5068_v6 }
 0x34c   :  { %v2972_v22 = vsel %vm2968_vm2, %v2953_v39, 0.0  ;;  %v3430_v40 = vpop.f32.mrf.mxu1  ;;  %2976 = vadd.xlane.f32.xlu1 %v2975_v61 }
 0x34d   :  { %2973 = vadd.xlane.f32.xlu0 %v2972_v22  ;;  %v2955_v53 = vmul.f32 %v5074_v2, %v2932_v24  ;;  %v3431_v1 = vadd.f32 %v3430_v40, %v3429_v38 }
 0x34e   :  { %v3432_v44 = vpop.f32.mrf.mxu1 }
 0x34f   :  { %v3500_v25 = vpop.f32.mrf.mxu0  ;;  %v2978_v9 = vsel %vm2968_vm2, %v2955_v53, 0.0  ;;  %v2789_v43 = vadd.f32 %v3431_v1, %v5068_v6 }
 0x350   :  { %v3433_v58 = vpop.f32.mrf.mxu1  ;;  %2979 = vadd.xlane.f32.xlu1 %v2978_v9  ;;  %v3017_v9 = vld [vmem:[#allocation2] sm:$0x1] }
 0x351   :  { %v2882_v11 = vpop.f32.mrf.mxu0  ;;  %v3434_v7 = vadd.f32 %v3433_v58, %v3432_v44 }
 0x352   :  { %v2883_v29 = vadd.f32 %v2882_v11, %v2786_v28  ;;  %v3435_v17 = vpop.f32.mrf.mxu1 }
 0x353   :  { %v3501_v60 = vpop.f32.mrf.mxu0  ;;  %v2794_v21 = vadd.f32 %v3434_v7, %v5068_v6 }
 0x354   :  { %v2933_v30 = vmax.f32 %v2883_v29, 0.0  ;;  %v3436_v41 = vpop.f32.mrf.mxu1 }
 0x355   :  { %v2885_v52 = vpop.f32.mrf.mxu0  ;;  %v2891_v48 = vadd.f32 %v3500_v25, %v2794_v21  ;;  %v3437_v62 = vadd.f32 %v3436_v41, %v3435_v17 }
 0x356   :  { %v2886_v27 = vadd.f32 %v2885_v52, %v2789_v43  ;;  %v2956_v49 = vmul.f32 %v5074_v2, %v2933_v30  ;;  %v3438_v56 = vpop.f32.mrf.mxu1 }
 0x357   :  { %v2797_v36 = vadd.f32 %v3437_v62, %v5068_v6  ;;  %v2935_v13 = vmax.f32 %v2891_v48, 0.0 }
 0x358   :  { %v2934_v59 = vmax.f32 %v2886_v27, 0.0  ;;  %v2981_v51 = vsel %vm2968_vm2, %v2956_v49, 0.0  ;;  %v3439_v20 = vpop.f32.mrf.mxu1 }
 0x359   :  { %2982 = vadd.xlane.f32.xlu0 %v2981_v51  ;;  %v2894_v57 = vadd.f32 %v3501_v60, %v2797_v36  ;;  %v2958_v8 = vmul.f32 %v5074_v2, %v2935_v13  ;;  %v3440_v45 = vadd.f32 %v3439_v20, %v3438_v56 }
 0x35a   :  { %v2957_v12 = vmul.f32 %v5074_v2, %v2934_v59  ;;  %v3441_v3 = vpop.f32.mrf.mxu1 }
 0x35b   :  { %v2987_v5 = vsel %vm2968_vm2, %v2958_v8, 0.0  ;;  %v2936_v63 = vmax.f32 %v2894_v57, 0.0  ;;  %v2802_v35 = vadd.f32 %v3440_v45, %v5068_v6 }
 0x35c   :  { %v2984_v46 = vsel %vm2968_vm2, %v2957_v12, 0.0  ;;  %v3442_v33 = vpop.f32.mrf.mxu1 }
 0x35d   :  { %2985 = vadd.xlane.f32.xlu1 %v2984_v46  ;;  %2988 = vadd.xlane.f32.xlu0 %v2987_v5  ;;  %v2959_v23 = vmul.f32 %v5074_v2, %v2936_v63  ;;  %v3443_v42 = vadd.f32 %v3442_v33, %v3441_v3 }
 0x35e   :  { %v3444_v32 = vpop.f32.mrf.mxu1 }
 0x35f   :  { %v3504_v31 = vpop.f32.mrf.mxu0  ;;  %v2990_v55 = vsel %vm2968_vm2, %v2959_v23, 0.0  ;;  %v2805_v37 = vadd.f32 %v3443_v42, %v5068_v6 }
 0x360   :  { %v3445_v26 = vpop.f32.mrf.mxu1 }
 0x361   :  { %v2898_v34 = vpop.f32.mrf.mxu0  ;;  %2991 = vadd.xlane.f32.xlu0 %v2990_v55  ;;  %v3446_v47 = vadd.f32 %v3445_v26, %v3444_v32 }
 0x362   :  { %v2899_v18 = vadd.f32 %v2898_v34, %v2802_v35  ;;  %v3447_v15 = vpop.f32.mrf.mxu1 }
 0x363   :  { %v3505_v16 = vpop.f32.mrf.mxu0  ;;  %v2810_v10 = vadd.f32 %v3446_v47, %v5068_v6 }
 0x364   :  { %v2937_v14 = vmax.f32 %v2899_v18, 0.0  ;;  %v3448_v54 = vpop.f32.mrf.mxu1 }
 0x365   :  { %v2901_v4 = vpop.f32.mrf.mxu0  ;;  %v2907_v0 = vadd.f32 %v3504_v31, %v2810_v10  ;;  %v3449_v50 = vadd.f32 %v3448_v54, %v3447_v15  ;;  %v5309_v54 = vlaneseq }
 0x366   :  { %v2902_v39 = vadd.f32 %v2901_v4, %v2805_v37  ;;  %v2960_v38 = vmul.f32 %v5074_v2, %v2937_v14  ;;  %v3450_v19 = vpop.f32.mrf.mxu1 }
 0x367   :  { %v2813_v61 = vadd.f32 %v3449_v50, %v5068_v6  ;;  %v2939_v40 = vmax.f32 %v2907_v0, 0.0  ;;  %v5124_v4 = vand.u32 127, %v5309_v54 }
 0x368   :  { %v2938_v22 = vmax.f32 %v2902_v39, 0.0  ;;  %v2993_v24 = vsel %vm2968_vm2, %v2960_v38, 0.0  ;;  %v3451_v53 = vpop.f32.mrf.mxu1  ;;  %v5310_v39 = vld [vmem:[#allocation11_spill] sm:$0xff] }
 0x369   :  { %2994 = vadd.xlane.f32.xlu0 %v2993_v24  ;;  %v2910_v44 = vadd.f32 %v3505_v16, %v2813_v61  ;;  %v2962_v25 = vmul.f32 %v5074_v2, %v2939_v40  ;;  %v3452_v28 = vadd.f32 %v3451_v53, %v3450_v19  ;;  %v3065_v38 = vadd.s32 4294967288, %v5124_v4  ;;  %v5311_v24 = vld [vmem:[#allocation10_spill] sm:$0xff] }
 0x36a   :  { %v3453_v1 = vpop.f32.mrf.mxu1  ;;  %v2961_v11 = vmul.f32 %v5074_v2, %v2938_v22  ;;  %v3072_v19 = vadd.s32 4294967280, %v5124_v4  ;;  %v3063_v40 = vsub.s32 %v5124_v4, %v5311_v24  ;;  %v3156_v54 = vadd.s32 4294967184, %v5124_v4 }
 0x36b   :  { %v2999_v58 = vsel %vm2968_vm2, %v2962_v25, 0.0  ;;  %v2940_v7 = vmax.f32 %v2910_v44, 0.0  ;;  %v2818_v43 = vadd.f32 %v3452_v28, %v5068_v6  ;;  %v3068_v53 = vsub.s32 %v3065_v38, %v5311_v24 }
 0x36c   :  { %v3454_v29 = vpop.f32.mrf.mxu1  ;;  %v2996_v41 = vsel %vm2968_vm2, %v2961_v11, 0.0 }
 0x36d   :  { %3000 = vadd.xlane.f32.xlu0 %v2999_v58  ;;  %v2963_v17 = vmul.f32 %v5074_v2, %v2940_v7  ;;  %v3455_v30 = vadd.f32 %v3454_v29, %v3453_v1  ;;  %v3075_v1 = vsub.s32 %v3072_v19, %v5311_v24  ;;  %v3079_v58 = vadd.s32 4294967272, %v5124_v4 }
 0x36e   :  { %3020 = vperm.xlu1 %3522, %v3017_v9   ;;  %v3456_v60 = vpop.f32.mrf.mxu1  ;;  %v3086_v7 = vadd.s32 4294967264, %v5124_v4 }
 0x36f   :  { %v3508_v21 = vpop.f32.mrf.mxu0  ;;  %v3002_v52 = vsel %vm2968_vm2, %v2963_v17, 0.0  ;;  %v2821_v13 = vadd.f32 %v3455_v30, %v5068_v6  ;;  %v3093_v30 = vadd.s32 4294967256, %v5124_v4 }
 0x370   :  { %v3457_v48 = vpop.f32.mrf.mxu1 }
 0x371   :  { %v2914_v62 = vpop.f32.mrf.mxu0  ;;  %2997 = vadd.xlane.f32.xlu0 %v2996_v41  ;;  %v3458_v27 = vadd.f32 %v3457_v48, %v3456_v60 }
 0x372   :  { %v2915_v49 = vadd.f32 %v2914_v62, %v2818_v43  ;;  %v3459_v56 = vpop.f32.mrf.mxu1 }
 0x373   :  { %v3509_v36 = vpop.f32.mrf.mxu0  ;;  %v2826_v59 = vadd.f32 %v3458_v27, %v5068_v6  ;;  %v3100_v27 = vadd.s32 4294967248, %v5124_v4 }
 0x374   :  { %v2941_v51 = vmax.f32 %v2915_v49, 0.0  ;;  %v3460_v20 = vpop.f32.mrf.mxu1 }
 0x375   :  { %v2917_v57 = vpop.f32.mrf.mxu0  ;;  %v2923_v12 = vadd.f32 %v3508_v21, %v2826_v59  ;;  %v3461_v8 = vadd.f32 %v3460_v20, %v3459_v56  ;;  %v3082_v21 = vsub.s32 %v3079_v58, %v5311_v24 }
 0x376   :  { %v2918_v3 = vadd.f32 %v2917_v57, %v2821_v13  ;;  %v2964_v45 = vmul.f32 %v5074_v2, %v2941_v51  ;;  %v3107_v51 = vadd.s32 4294967240, %v5124_v4  ;;  %v3114_v13 = vadd.s32 4294967232, %v5124_v4 }
 0x377   :  { %v2829_v46 = vadd.f32 %v3461_v8, %v5068_v6  ;;  %v2943_v33 = vmax.f32 %v2923_v12, 0.0  ;;  %v3103_v12 = vsub.s32 %v3100_v27, %v5311_v24 }
 0x378   :  { %v2942_v5 = vmax.f32 %v2918_v3, 0.0  ;;  %v3005_v63 = vsel %vm2968_vm2, %v2964_v45, 0.0  ;;  %v3121_v45 = vadd.s32 4294967224, %v5124_v4 }
 0x379   :  { %3006 = vadd.xlane.f32.xlu0 %v3005_v63  ;;  %v2926_v23 = vadd.f32 %v3509_v36, %v2829_v46  ;;  %v2966_v32 = vmul.f32 %v5074_v2, %v2943_v33  ;;  %v3096_v36 = vsub.s32 %v3093_v30, %v5311_v24 }
 0x37a   :  { %v2965_v42 = vmul.f32 %v5074_v2, %v2942_v5  ;;  %v3110_v5 = vsub.s32 %v3107_v51, %v5311_v24 }
 0x37b   :  { %v3011_v31 = vsel %vm2968_vm2, %v2966_v32, 0.0  ;;  %v2944_v35 = vmax.f32 %v2926_v23, 0.0  ;;  %v3117_v23 = vsub.s32 %v3114_v13, %v5311_v24 }
 0x37c   :  { %v3008_v55 = vsel %vm2968_vm2, %v2965_v42, 0.0 }
 0x37d   :  { %3012 = vadd.xlane.f32.xlu0 %v3011_v31  ;;  %v2967_v26 = vmul.f32 %v5074_v2, %v2944_v35  ;;  %v3124_v31 = vsub.s32 %v3121_v45, %v5311_v24 }
 0x37f   :  { %v3014_v6 = vsel %vm2968_vm2, %v2967_v26, 0.0 }
 0x381   :  { %3009 = vadd.xlane.f32.xlu0 %v3008_v55  ;;  %v3128_v55 = vadd.s32 4294967216, %v5124_v4 }
 0x385   :  { %3015 = vadd.xlane.f32.xlu0 %v3014_v6 }
 0x392   :  { %3003 = vadd.xlane.f32.xlu1 %v3002_v52  ;;  %v3089_v52 = vsub.s32 %v3086_v7, %v5311_v24 }
 0x3d2   :  { %v2971_v34 = vpop.xlane.xlu0 %2970 }
 0x3d5   :  { %v2977_v18 = vpop.xlane.xlu1 %2976 }
 0x3d6   :  { %v2974_v47 = vpop.xlane.xlu0 %2973 }
 0x3d9   :  { %v2980_v16 = vpop.xlane.xlu1 %2979 }
 0x3e2   :  { %v2983_v15 = vpop.xlane.xlu0 %2982 }
 0x3e6   :  { %v2989_v10 = vpop.xlane.xlu0 %2988  ;;  %v2986_v14 = vpop.xlane.xlu1 %2985 }
 0x3ea   :  { %v2992_v37 = vpop.xlane.xlu0 %2991  ;;  %v3021_v0 = vpop.permute.xlu1 %3020 }
 0x3eb   :  { %v5127_v2 = vrot.slane %v3021_v0, %v5310_v39  ;;  %v3163_v0 = vadd.s32 4294967176, %v5124_v4 }
 0x3ed   :  { %v3027_v61 = vadd.f32 %v5127_v2, %v2971_v34  ;;  %v3028_v22 = vadd.f32 %v5127_v2, %v2974_v47  ;;  %v3029_v25 = vadd.f32 %v5127_v2, %v2977_v18  ;;  %v3030_v17 = vadd.f32 %v5127_v2, %v2980_v16 }
 0x3ee   :  { %v3031_v43 = vadd.f32 %v5127_v2, %v2983_v15  ;;  %v3032_v49 = vadd.f32 %v5127_v2, %v2986_v14  ;;  %v3033_v20 = vadd.f32 %v5127_v2, %v2989_v10  ;;  %v3034_v63 = vadd.f32 %v5127_v2, %v2992_v37 }
 0x3ef   :  { %v3064_v9 = vrot.slane %v3027_v61, %v3063_v40  ;;  %v3069_v28 = vrot.slane %v3028_v22, %v3068_v53  ;;  %v3076_v11 = vrot.slane %v3029_v25, %v3075_v1  ;;  %v3083_v62 = vrot.slane %v3030_v17, %v3082_v21 }
 0x3f0   :  { %v3090_v59 = vrot.slane %v3031_v43, %v3089_v52  ;;  %v3097_v3 = vrot.slane %v3032_v49, %v3096_v36  ;;  %v3104_v33 = vrot.slane %v3033_v20, %v3103_v12  ;;  %v3111_v6 = vrot.slane %v3034_v63, %v3110_v5 }
 0x3f1   :  { %v3071_v60 = vsel %vm3070_vm3, %v3069_v28, %v3064_v9  ;;  %v3135_v34 = vadd.s32 4294967208, %v5124_v4  ;;  %v3142_v18 = vadd.s32 4294967200, %v5124_v4  ;;  %v3149_v10 = vadd.s32 4294967192, %v5124_v4 }
 0x3f2   :  { %v2995_v50 = vpop.xlane.xlu0 %2994  ;;  %v3078_v41 = vsel %vm3077_vm4, %v3076_v11, %v3071_v60  ;;  %v3131_v14 = vsub.s32 %v3128_v55, %v5311_v24  ;;  %v3159_v4 = vsub.s32 %v3156_v54, %v5311_v24  ;;  %v3166_v28 = vsub.s32 %v3163_v0, %v5311_v24 }
 0x3f3   :  { %v3085_v56 = vsel %vm3084_vm5, %v3083_v62, %v3078_v41  ;;  %v3035_v32 = vadd.f32 %v5127_v2, %v2995_v50  ;;  %v3138_v50 = vsub.s32 %v3135_v34, %v5311_v24  ;;  %v3145_v38 = vsub.s32 %v3142_v18, %v5311_v24 }
 0x3f4   :  { %v3092_v57 = vsel %vm3091_vm6, %v3090_v59, %v3085_v56  ;;  %v3152_v53 = vsub.s32 %v3149_v10, %v5311_v24 }
 0x3f5   :  { %v3099_v46 = vsel %vm3098_vm7, %v3097_v3, %v3092_v57  ;;  %v3118_v47 = vrot.slane %v3035_v32, %v3117_v23 }
 0x3f6   :  { %v3001_v44 = vpop.xlane.xlu0 %3000  ;;  %v3106_v35 = vsel %vm3105_vm8, %v3104_v33, %v3099_v46 }
 0x3f7   :  { %v3113_v15 = vsel %vm3112_vm9, %v3111_v6, %v3106_v35  ;;  %v3037_v37 = vadd.f32 %v5127_v2, %v3001_v44 }
 0x3f8   :  { %v3120_v39 = vsel %vm3119_vm10, %v3118_v47, %v3113_v15 }
 0x3f9   :  { %v3132_v1 = vrot.slane %v3037_v37, %v3131_v14 }
 0x3fa   :  { %v2998_v29 = vpop.xlane.xlu0 %2997 }
 0x3fb   :  { %v3036_v42 = vadd.f32 %v5127_v2, %v2998_v29 }
 0x3fd   :  { %v3125_v16 = vrot.slane %v3036_v42, %v3124_v31 }
 0x3ff   :  { %v3127_v40 = vsel %vm3126_vm11, %v3125_v16, %v3120_v39 }
 0x400   :  { %v3134_v29 = vsel %vm3133_vm12, %v3132_v1, %v3127_v40 }
 0x402   :  { %v3007_v48 = vpop.xlane.xlu0 %3006 }
 0x403   :  { %v3039_v19 = vadd.f32 %v5127_v2, %v3007_v48 }
 0x405   :  { %v3146_v7 = vrot.slane %v3039_v19, %v3145_v38 }
 0x406   :  { %v3013_v8 = vpop.xlane.xlu0 %3012 }
 0x407   :  { %v3041_v9 = vadd.f32 %v5127_v2, %v3013_v8 }
 0x409   :  { %v3160_v21 = vrot.slane %v3041_v9, %v3159_v4 }
 0x40a   :  { %v3010_v26 = vpop.xlane.xlu0 %3009 }
 0x40b   :  { %v3040_v44 = vadd.f32 %v5127_v2, %v3010_v26 }
 0x40d   :  { %v3153_v17 = vrot.slane %v3040_v44, %v3152_v53 }
 0x40e   :  { %v3016_v61 = vpop.xlane.xlu0 %3015 }
 0x40f   :  { %v3042_v58 = vadd.f32 %v5127_v2, %v3016_v61 }
 0x411   :  { %v3167_v43 = vrot.slane %v3042_v58, %v3166_v28 }
 0x41b   :  { %v3004_v22 = vpop.xlane.xlu1 %3003 }
 0x41c   :  { %v3038_v25 = vadd.f32 %v5127_v2, %v3004_v22 }
 0x41e   :  { %v3139_v11 = vrot.slane %v3038_v25, %v3138_v50 }
 0x420   :  { %v3141_v60 = vsel %vm3140_vm13, %v3139_v11, %v3134_v29 }
 0x421   :  { %v3148_v30 = vsel %vm3147_vm14, %v3146_v7, %v3141_v60 }
 0x422   :  { %v3155_v41 = vsel %vm3154_vm15, %v3153_v17, %v3148_v30 }
 0x423   :  { %v3162_v52 = vsel %vm3161_vm0, %v3160_v21, %v3155_v41 }
 0x424   :  { %v3169_v48 = vsel %vm3168_vm1, %v3167_v43, %v3162_v52 }
 0x425   :  { %3171 = vst [vmem:[%s5190_s9] sm:$0x1] %v3169_v48 }
 0x426   :  { %3176 = vsyncpa [#allocation4], 1 }

</bundles_post_ra>
